<compile_context>
chip_gen: v7x
topology: tpu7x:2x2x1
jax: 0.10.0
libtpu: 0.0.40
codegen_flags: <defaults>
</compile_context>

<pallas_src>
import functools
import math

import jax
import jax.numpy as jnp
from jax.experimental import pallas as pl
from jax.experimental.pallas import tpu as pltpu

_LANE = 128
_NEG = -1e30  # adjacency padding: exp(_NEG - max) underflows to exactly 0


def _round_up(v, m):
    return ((v + m - 1) // m) * m


def _pad2(a, rows, cols, value=0.0):
    r, c = a.shape
    if r == rows and c == cols:
        return a
    return jnp.pad(a, ((0, rows - r), (0, cols - c)), constant_values=value)


# --------------------------------------------------------------------------
# Phase 1: xw = x @ W and row-softmax(adj) (both stored bf16).
# grid = (nN1,) -- fully "parallel" (column stats are computed outside).
# --------------------------------------------------------------------------
def _prep_kernel(x_ref, adj_ref, w_ref, xw_ref, adjsm_ref):
    xw = jnp.dot(x_ref[...].astype(jnp.float32),
                 w_ref[...].astype(jnp.float32),
                 preferred_element_type=jnp.float32)
    xw_ref[...] = xw.astype(jnp.bfloat16)

    adj = adj_ref[...].astype(jnp.float32)                  # (TN1, Ep)
    rmax = jnp.max(adj, axis=1, keepdims=True)
    rexp = jnp.exp(adj - rmax)
    rinv = 1.0 / jnp.sum(rexp, axis=1, keepdims=True)       # one divide / row
    # NOTE: padded N rows come out uniform (1/Ep), not 0; they only feed
    # padded node rows which are sliced off by the wrapper.
    adjsm_ref[...] = (rexp * rinv).astype(jnp.bfloat16)


# --------------------------------------------------------------------------
# Phase 2: e1 = relu(softmax(adj.T) @ xw) @ W3, plus bf16 cache of
# softmax(adj.T).  grid = (nE parallel, nN arbitrary contraction).
# --------------------------------------------------------------------------
def _edge_kernel(adj_ref, cmax_ref, csum_ref, xw_ref, w3_ref,
                 e1_ref, pt_ref, acc_ref):
    k = pl.program_id(1)

    @pl.when(k == 0)
    def _():
        acc_ref[...] = jnp.zeros_like(acc_ref)

    adj = adj_ref[...].astype(jnp.float32)                   # (TN, TE)
    cinv = 1.0 / csum_ref[...]                                # (1, TE)
    p = jnp.exp(adj - cmax_ref[...]) * cinv                   # column softmax
    pt = p.astype(jnp.bfloat16).T                             # bf16 *before* XLU
    pt_ref[...] = pt                                          # reused in phase 4

    acc_ref[...] += jnp.dot(pt.astype(jnp.float32),
                            xw_ref[...].astype(jnp.float32),
                            preferred_element_type=jnp.float32)

    @pl.when(k == pl.num_programs(1) - 1)
    def _():
        edge = jnp.maximum(acc_ref[...], 0.0)
        e1 = jnp.dot(edge, w3_ref[...].astype(jnp.float32),
                     preferred_element_type=jnp.float32)
        e1_ref[...] = e1.astype(jnp.bfloat16)


# --------------------------------------------------------------------------
# Phase 3: node = relu(softmax(adj) @ e1); also emits a bf16 copy for phase 4.
# Accumulates directly in the VMEM-resident output block (no scratch).
# grid = (nN parallel, nE arbitrary contraction).
# --------------------------------------------------------------------------
def _node_kernel(adjsm_ref, e1_ref, node_ref, nodeb_ref):
    e = pl.program_id(1)

    @pl.when(e == 0)
    def _():
        node_ref[...] = jnp.zeros_like(node_ref)

    node_ref[...] += jnp.dot(adjsm_ref[...].astype(jnp.float32),
                             e1_ref[...].astype(jnp.float32),
                             preferred_element_type=jnp.float32)

    @pl.when(e == pl.num_programs(1) - 1)
    def _():
        v = jnp.maximum(node_ref[...], 0.0)
        node_ref[...] = v
        nodeb_ref[...] = v.astype(jnp.bfloat16)


# --------------------------------------------------------------------------
# Phase 4: edge_out = relu(softmax(adj.T) @ node), reusing the bf16 pt cache.
# Accumulates directly in the output block.
# grid = (nE parallel, nN arbitrary contraction).
# --------------------------------------------------------------------------
def _edge_out_kernel(pt_ref, node_ref, out_ref):
    k = pl.program_id(1)

    @pl.when(k == 0)
    def _():
        out_ref[...] = jnp.zeros_like(out_ref)

    out_ref[...] += jnp.dot(pt_ref[...].astype(jnp.float32),
                            node_ref[...].astype(jnp.float32),
                            preferred_element_type=jnp.float32)

    @pl.when(k == pl.num_programs(1) - 1)
    def _():
        out_ref[...] = jnp.maximum(out_ref[...], 0.0)


@functools.partial(jax.jit, static_argnames=("tile_n", "tile_e"))
def hgat_forward(x, adj, weight, weight3, *, tile_n=512, tile_e=512):
    """Pallas implementation of HGATLayer.forward (eval mode).

    x: (N, F_in) f32, adj: (N, E) f32, weight: (F_in, F_out),
    weight3: (F_out, F_out).  Returns (node (N, F_out), edge (E, F_out)) f32.
    """
    assert tile_n % _LANE == 0 and tile_e % _LANE == 0
    N, F_in = x.shape
    _, E = adj.shape
    F_out = weight.shape[1]

    TN = tile_n if N > tile_n else _round_up(N, _LANE)
    TE = tile_e if E > tile_e else _round_up(E, _LANE)
    Np, Ep = _round_up(N, TN), _round_up(E, TE)
    Fip, Fp = _round_up(F_in, _LANE), _round_up(F_out, _LANE)
    nN, nE = Np // TN, Ep // TE

    # Phase-1 row tile is decoupled from TN: its blocks span the full padded E,
    # so keep the row tile <= 256 to bound VMEM (always divides TN / Np).
    TN1 = 256 if TN % 256 == 0 else 128
    nN1 = Np // TN1

    # Lane-dense padding; all HBM-side tensors stored bf16 (adj with -1e30
    # softmax-safe padding).  Kernels upcast to f32 at the MXU.
    x_p = _pad2(x.astype(jnp.float32), Np, Fip).astype(jnp.bfloat16)
    w_p = _pad2(weight.astype(jnp.float32), Fip, Fp).astype(jnp.bfloat16)
    w3_p = _pad2(weight3.astype(jnp.float32), Fp, Fp).astype(jnp.bfloat16)
    adj_p = _pad2(adj.astype(jnp.float32), Np, Ep, value=_NEG).astype(jnp.bfloat16)

    # Per-column softmax stats (for softmax(adj.T, dim=1)) as a tiny fused XLA
    # reduction over axis 0 -- keeps phase 1 fully parallel across TensorCores.
    adj_f = adj_p.astype(jnp.float32)
    cmax = jnp.max(adj_f, axis=0, keepdims=True)                 # (1, Ep)
    csum = jnp.sum(jnp.exp(adj_f - cmax), axis=0, keepdims=True)  # (1, Ep)

    # ---------------- Phase 1 ----------------
    xw, adj_sm = pl.pallas_call(
        _prep_kernel,
        grid=(nN1,),
        in_specs=[
            pl.BlockSpec((TN1, Fip), lambda i: (i, 0)),
            pl.BlockSpec((TN1, Ep), lambda i: (i, 0)),
            pl.BlockSpec((Fip, Fp), lambda i: (0, 0)),
        ],
        out_specs=(
            pl.BlockSpec((TN1, Fp), lambda i: (i, 0)),
            pl.BlockSpec((TN1, Ep), lambda i: (i, 0)),
        ),
        out_shape=(
            jax.ShapeDtypeStruct((Np, Fp), jnp.bfloat16),    # xw
            jax.ShapeDtypeStruct((Np, Ep), jnp.bfloat16),    # softmax(adj, dim=1)
        ),
        compiler_params=pltpu.CompilerParams(
            dimension_semantics=("parallel",)),
        cost_estimate=pl.CostEstimate(
            flops=2 * Np * Fip * Fp + 6 * Np * Ep,
            transcendentals=Np * Ep,
            bytes_accessed=2 * Np * Fip + 2 * Np * Ep + 2 * Fip * Fp
                           + 2 * Np * Fp + 2 * Np * Ep),
    )(x_p, adj_p, w_p)

    # ---------------- Phase 2 ----------------
    e1, pt = pl.pallas_call(
        _edge_kernel,
        grid=(nE, nN),
        in_specs=[
            pl.BlockSpec((TN, TE), lambda j, k: (k, j)),     # adj block (bf16)
            pl.BlockSpec((1, TE), lambda j, k: (0, j)),      # column max
            pl.BlockSpec((1, TE), lambda j, k: (0, j)),      # column sum-exp
            pl.BlockSpec((TN, Fp), lambda j, k: (k, 0)),     # xw (bf16)
            pl.BlockSpec((Fp, Fp), lambda j, k: (0, 0)),     # weight3 (resident)
        ],
        out_specs=(
            pl.BlockSpec((TE, Fp), lambda j, k: (j, 0)),     # e1 (bf16)
            pl.BlockSpec((TE, TN), lambda j, k: (j, k)),     # softmax(adj.T) bf16
        ),
        out_shape=(
            jax.ShapeDtypeStruct((Ep, Fp), jnp.bfloat16),
            jax.ShapeDtypeStruct((Ep, Np), jnp.bfloat16),
        ),
        scratch_shapes=[pltpu.VMEM((TE, Fp), jnp.float32)],
        compiler_params=pltpu.CompilerParams(
            dimension_semantics=("parallel", "arbitrary")),
        cost_estimate=pl.CostEstimate(
            flops=2 * Ep * Np * Fp + 2 * Ep * Fp * Fp + 4 * Np * Ep,
            transcendentals=Np * Ep,
            bytes_accessed=2 * Np * Ep + 8 * Ep * nN + 2 * Np * Fp * nE
                           + 2 * Fp * Fp + 2 * Ep * Fp + 2 * Ep * Np),
    )(adj_p, cmax, csum, xw, w3_p)

    # ---------------- Phase 3 ----------------
    node_p, node_b = pl.pallas_call(
        _node_kernel,
        grid=(nN, nE),
        in_specs=[
            pl.BlockSpec((TN, TE), lambda i, e: (i, e)),     # softmax(adj) bf16
            pl.BlockSpec((TE, Fp), lambda i, e: (e, 0)),     # e1 bf16
        ],
        out_specs=(
            pl.BlockSpec((TN, Fp), lambda i, e: (i, 0)),     # node f32 (returned)
            pl.BlockSpec((TN, Fp), lambda i, e: (i, 0)),     # node bf16 (phase 4)
        ),
        out_shape=(
            jax.ShapeDtypeStruct((Np, Fp), jnp.float32),
            jax.ShapeDtypeStruct((Np, Fp), jnp.bfloat16),
        ),
        compiler_params=pltpu.CompilerParams(
            dimension_semantics=("parallel", "arbitrary")),
        cost_estimate=pl.CostEstimate(
            flops=2 * Np * Ep * Fp,
            transcendentals=0,
            bytes_accessed=2 * Np * Ep + 2 * Ep * Fp * nN + 6 * Np * Fp),
    )(adj_sm, e1)

    # ---------------- Phase 4 ----------------
    edge_p = pl.pallas_call(
        _edge_out_kernel,
        grid=(nE, nN),
        in_specs=[
            pl.BlockSpec((TE, TN), lambda j, k: (j, k)),     # softmax(adj.T) bf16
            pl.BlockSpec((TN, Fp), lambda j, k: (k, 0)),     # node bf16
        ],
        out_specs=pl.BlockSpec((TE, Fp), lambda j, k: (j, 0)),
        out_shape=jax.ShapeDtypeStruct((Ep, Fp), jnp.float32),
        compiler_params=pltpu.CompilerParams(
            dimension_semantics=("parallel", "arbitrary")),
        cost_estimate=pl.CostEstimate(
            flops=2 * Ep * Np * Fp,
            transcendentals=0,
            bytes_accessed=2 * Ep * Np + 2 * Np * Fp * nE + 4 * Ep * Fp),
    )(pt, node_b)

    return node_p[:N, :F_out], edge_p[:E, :F_out]


def hgat_reference(x, adj, weight, weight3):
    xw = x @ weight
    adjt = jax.nn.softmax(adj.T, axis=1)
    edge = jnp.maximum(adjt @ xw, 0.0)
    e1 = edge @ weight3
    adj_sm = jax.nn.softmax(adj, axis=1)
    node = jnp.maximum(adj_sm @ e1, 0.0)
    edge_out = jnp.maximum(adjt @ node, 0.0)
    return node, edge_out


if __name__ == "__main__":
    def _check(N, E, F_in, F_out, seed, **tiles):
        key = jax.random.PRNGKey(seed)
        kx, kadj, kw, kw3 = jax.random.split(key, 4)
        x = jax.random.normal(kx, (N, F_in), dtype=jnp.float32)
        adj = jax.random.uniform(kadj, (N, E), dtype=jnp.float32)
        stdv = 1.0 / math.sqrt(F_out)
        weight = jax.random.uniform(kw, (F_in, F_out), minval=-stdv,
                                    maxval=stdv, dtype=jnp.float32)
        weight3 = jax.random.uniform(kw3, (F_out, F_out), minval=-stdv,
                                     maxval=stdv, dtype=jnp.float32)

        node, edge = hgat_forward(x, adj, weight, weight3, **tiles)
        jax.block_until_ready((node, edge))

        node_ref, edge_ref = hgat_reference(x, adj, weight, weight3)
        # bf16 HBM intermediates -> loosened tolerance vs f32 reference.
        n_err = float(jnp.max(jnp.abs(node - node_ref)))
        e_err = float(jnp.max(jnp.abs(edge - edge_ref)))
        assert bool(jnp.allclose(node, node_ref, atol=2e-2, rtol=5e-2)), \
            f"node mismatch (max abs err {n_err})"
        assert bool(jnp.allclose(edge, edge_ref, atol=2e-2, rtol=5e-2)), \
            f"edge mismatch (max abs err {e_err})"

    # Small, module-consistent smoke test (N=16 nodes, E=8 hyperedges, F=32).
    _check(16, 8, 32, 32, seed=0)
    # Non-aligned, multi-tile shapes exercising padding + grid accumulation.
    _check(300, 200, 72, 96, seed=1, tile_n=128, tile_e=128)

    print("KERNEL_OK")
</pallas_src>

<mosaic_0001>
module attributes {stable_mosaic.version = 11 : i64} {
  func.func @_prep_kernel(%arg0: i32, %arg1: memref<128x128xbf16, #tpu.memory_space<vmem>>, %arg2: memref<128x128xbf16, #tpu.memory_space<vmem>>, %arg3: memref<128x128xbf16, #tpu.memory_space<vmem>>, %arg4: memref<128x128xbf16, #tpu.memory_space<vmem>>, %arg5: memref<128x128xbf16, #tpu.memory_space<vmem>>) attributes {dimension_semantics = [#tpu.dimension_semantics<parallel>], iteration_bounds = array<i64: 1>, scalar_prefetch = 0 : i64, scratch_operands = 0 : i64, tpu.core_type = #tpu.core_type<tc>, window_params = [{transform_indices = @transform_0, window_bounds = array<i64: 128, 128>}, {transform_indices = @transform_1, window_bounds = array<i64: 128, 128>}, {pipeline_mode = #tpu.pipeline_mode<synchronous>, transform_indices = @transform_2, window_bounds = array<i64: 128, 128>}, {transform_indices = @transform_3, window_bounds = array<i64: 128, 128>}, {transform_indices = @transform_4, window_bounds = array<i64: 128, 128>}]} {
    %c0 = arith.constant 0 : index
    %c0_0 = arith.constant 0 : index
    %0 = vector.load %arg1[%c0, %c0_0] : memref<128x128xbf16, #tpu.memory_space<vmem>>, vector<128x128xbf16>
    %1 = arith.extf %0 : vector<128x128xbf16> to vector<128x128xf32>
    %c0_1 = arith.constant 0 : index
    %c0_2 = arith.constant 0 : index
    %2 = vector.load %arg3[%c0_1, %c0_2] : memref<128x128xbf16, #tpu.memory_space<vmem>>, vector<128x128xbf16>
    %3 = arith.extf %2 : vector<128x128xbf16> to vector<128x128xf32>
    %cst = arith.constant dense<0.000000e+00> : vector<128x128xf32>
    %4 = tpu.matmul %1, %3, %cst {dimension_numbers = #tpu.dot_dimension_numbers<[1], [0], [0], [1], [0, 0, 1, 1], [], []>} : vector<128x128xf32>, vector<128x128xf32>, vector<128x128xf32> -> vector<128x128xf32>
    %5 = arith.truncf %4 : vector<128x128xf32> to vector<128x128xbf16>
    %c0_3 = arith.constant 0 : index
    %c0_4 = arith.constant 0 : index
    %6 = vector.load %arg4[%c0_3, %c0_4] : memref<128x128xbf16, #tpu.memory_space<vmem>>, vector<128x128xbf16>
    tpu.vector_store %arg4[%c0_3, %c0_4], %5 {strides = array<i32>} : memref<128x128xbf16, #tpu.memory_space<vmem>>, vector<128x128xbf16>,
    %c0_5 = arith.constant 0 : index
    %c0_6 = arith.constant 0 : index
    %7 = vector.load %arg2[%c0_5, %c0_6] : memref<128x128xbf16, #tpu.memory_space<vmem>>, vector<128x128xbf16>
    %8 = arith.extf %7 : vector<128x128xbf16> to vector<128x128xf32>
    %cst_7 = arith.constant dense<0xFF800000> : vector<128xf32>
    %9 = vector.multi_reduction <maximumf>, %8, %cst_7 [1] : vector<128x128xf32> to vector<128xf32>
    %10 = vector.shape_cast %9 : vector<128xf32> to vector<128x1xf32>
    %11 = vector.broadcast %10 : vector<128x1xf32> to vector<128x128xf32>
    %12 = arith.subf %8, %11 : vector<128x128xf32>
    %13 = math.exp %12 : vector<128x128xf32>
    %cst_8 = arith.constant dense<0.000000e+00> : vector<128xf32>
    %14 = vector.multi_reduction <add>, %13, %cst_8 [1] : vector<128x128xf32> to vector<128xf32>
    %15 = vector.shape_cast %14 : vector<128xf32> to vector<128x1xf32>
    %cst_9 = arith.constant 1.000000e+00 : f32
    %16 = vector.broadcast %cst_9 : f32 to vector<128x1xf32>
    %17 = arith.divf %16, %15 : vector<128x1xf32>
    %18 = vector.broadcast %17 : vector<128x1xf32> to vector<128x128xf32>
    %19 = arith.mulf %13, %18 : vector<128x128xf32>
    %20 = arith.truncf %19 : vector<128x128xf32> to vector<128x128xbf16>
    %c0_10 = arith.constant 0 : index
    %c0_11 = arith.constant 0 : index
    %21 = vector.load %arg5[%c0_10, %c0_11] : memref<128x128xbf16, #tpu.memory_space<vmem>>, vector<128x128xbf16>
    tpu.vector_store %arg5[%c0_10, %c0_11], %20 {strides = array<i32>} : memref<128x128xbf16, #tpu.memory_space<vmem>>, vector<128x128xbf16>,
    return
  }
  func.func @transform_0(%arg0: i32) -> (i32, i32) {
    %c0_i32 = arith.constant 0 : i32
    %c0_i32_0 = arith.constant 0 : i32
    return %arg0, %c0_i32 : i32, i32
  }
  func.func @transform_1(%arg0: i32) -> (i32, i32) {
    %c0_i32 = arith.constant 0 : i32
    %c0_i32_0 = arith.constant 0 : i32
    return %arg0, %c0_i32 : i32, i32
  }
  func.func @transform_2(%arg0: i32) -> (i32, i32) {
    %c0_i32 = arith.constant 0 : i32
    %c0_i32_0 = arith.constant 0 : i32
    %c0_i32_1 = arith.constant 0 : i32
    return %c0_i32, %c0_i32_0 : i32, i32
  }
  func.func @transform_3(%arg0: i32) -> (i32, i32) {
    %c0_i32 = arith.constant 0 : i32
    %c0_i32_0 = arith.constant 0 : i32
    return %arg0, %c0_i32 : i32, i32
  }
  func.func @transform_4(%arg0: i32) -> (i32, i32) {
    %c0_i32 = arith.constant 0 : i32
    %c0_i32_0 = arith.constant 0 : i32
    return %arg0, %c0_i32 : i32, i32
  }
}

module attributes {stable_mosaic.version = 11 : i64} {
  func.func @_node_kernel(%arg0: i32, %arg1: i32, %arg2: memref<128x128xbf16, #tpu.memory_space<vmem>>, %arg3: memref<128x128xbf16, #tpu.memory_space<vmem>>, %arg4: memref<128x128xf32, #tpu.memory_space<vmem>>, %arg5: memref<128x128xbf16, #tpu.memory_space<vmem>>) attributes {dimension_semantics = [#tpu.dimension_semantics<parallel>, #tpu.dimension_semantics<arbitrary>], iteration_bounds = array<i64: 1, 1>, scalar_prefetch = 0 : i64, scratch_operands = 0 : i64, tpu.core_type = #tpu.core_type<tc>, window_params = [{transform_indices = @transform_0, window_bounds = array<i64: 128, 128>}, {transform_indices = @transform_1, window_bounds = array<i64: 128, 128>}, {transform_indices = @transform_2, window_bounds = array<i64: 128, 128>}, {transform_indices = @transform_3, window_bounds = array<i64: 128, 128>}]} {
    %c0_i32 = arith.constant 0 : i32
    %0 = arith.cmpi eq, %arg1, %c0_i32 : i32
    %1 = arith.extui %0 : i1 to i32
    %c0_i32_0 = arith.constant 0 : i32
    %2 = arith.cmpi ne, %1, %c0_i32_0 : i32
    scf.if %2 {
      %cst_10 = arith.constant 0.000000e+00 : f32
      %14 = vector.broadcast %cst_10 : f32 to vector<128x128xf32>
      %c0_11 = arith.constant 0 : index
      %c0_12 = arith.constant 0 : index
      %15 = vector.load %arg4[%c0_11, %c0_12] : memref<128x128xf32, #tpu.memory_space<vmem>>, vector<128x128xf32>
      tpu.vector_store %arg4[%c0_11, %c0_12], %14 {strides = array<i32>} : memref<128x128xf32, #tpu.memory_space<vmem>>, vector<128x128xf32>,
    } else {
    }
    %c0 = arith.constant 0 : index
    %c0_1 = arith.constant 0 : index
    %3 = vector.load %arg4[%c0, %c0_1] : memref<128x128xf32, #tpu.memory_space<vmem>>, vector<128x128xf32>
    %c0_2 = arith.constant 0 : index
    %c0_3 = arith.constant 0 : index
    %4 = vector.load %arg2[%c0_2, %c0_3] : memref<128x128xbf16, #tpu.memory_space<vmem>>, vector<128x128xbf16>
    %5 = arith.extf %4 : vector<128x128xbf16> to vector<128x128xf32>
    %c0_4 = arith.constant 0 : index
    %c0_5 = arith.constant 0 : index
    %6 = vector.load %arg3[%c0_4, %c0_5] : memref<128x128xbf16, #tpu.memory_space<vmem>>, vector<128x128xbf16>
    %7 = arith.extf %6 : vector<128x128xbf16> to vector<128x128xf32>
    %cst = arith.constant dense<0.000000e+00> : vector<128x128xf32>
    %8 = tpu.matmul %5, %7, %cst {dimension_numbers = #tpu.dot_dimension_numbers<[1], [0], [0], [1], [0, 0, 1, 1], [], []>} : vector<128x128xf32>, vector<128x128xf32>, vector<128x128xf32> -> vector<128x128xf32>
    %9 = arith.addf %3, %8 : vector<128x128xf32>
    %c0_6 = arith.constant 0 : index
    %c0_7 = arith.constant 0 : index
    %10 = vector.load %arg4[%c0_6, %c0_7] : memref<128x128xf32, #tpu.memory_space<vmem>>, vector<128x128xf32>
    tpu.vector_store %arg4[%c0_6, %c0_7], %9 {strides = array<i32>} : memref<128x128xf32, #tpu.memory_space<vmem>>, vector<128x128xf32>,
    %c0_i32_8 = arith.constant 0 : i32
    %11 = arith.cmpi eq, %arg1, %c0_i32_8 : i32
    %12 = arith.extui %11 : i1 to i32
    %c0_i32_9 = arith.constant 0 : i32
    %13 = arith.cmpi ne, %12, %c0_i32_9 : i32
    scf.if %13 {
      %c0_10 = arith.constant 0 : index
      %c0_11 = arith.constant 0 : index
      %14 = vector.load %arg4[%c0_10, %c0_11] : memref<128x128xf32, #tpu.memory_space<vmem>>, vector<128x128xf32>
      %cst_12 = arith.constant 0.000000e+00 : f32
      %15 = vector.broadcast %cst_12 : f32 to vector<128x128xf32>
      %16 = arith.maximumf %14, %15 : vector<128x128xf32>
      %c0_13 = arith.constant 0 : index
      %c0_14 = arith.constant 0 : index
      %17 = vector.load %arg4[%c0_13, %c0_14] : memref<128x128xf32, #tpu.memory_space<vmem>>, vector<128x128xf32>
      tpu.vector_store %arg4[%c0_13, %c0_14], %16 {strides = array<i32>} : memref<128x128xf32, #tpu.memory_space<vmem>>, vector<128x128xf32>,
      %18 = arith.truncf %16 : vector<128x128xf32> to vector<128x128xbf16>
      %c0_15 = arith.constant 0 : index
      %c0_16 = arith.constant 0 : index
      %19 = vector.load %arg5[%c0_15, %c0_16] : memref<128x128xbf16, #tpu.memory_space<vmem>>, vector<128x128xbf16>
      tpu.vector_store %arg5[%c0_15, %c0_16], %18 {strides = array<i32>} : memref<128x128xbf16, #tpu.memory_space<vmem>>, vector<128x128xbf16>,
    } else {
    }
    return
  }
  func.func @transform_0(%arg0: i32, %arg1: i32) -> (i32, i32) {
    %c0_i32 = arith.constant 0 : i32
    return %arg0, %arg1 : i32, i32
  }
  func.func @transform_1(%arg0: i32, %arg1: i32) -> (i32, i32) {
    %c0_i32 = arith.constant 0 : i32
    %c0_i32_0 = arith.constant 0 : i32
    return %arg1, %c0_i32 : i32, i32
  }
  func.func @transform_2(%arg0: i32, %arg1: i32) -> (i32, i32) {
    %c0_i32 = arith.constant 0 : i32
    %c0_i32_0 = arith.constant 0 : i32
    return %arg0, %c0_i32 : i32, i32
  }
  func.func @transform_3(%arg0: i32, %arg1: i32) -> (i32, i32) {
    %c0_i32 = arith.constant 0 : i32
    %c0_i32_0 = arith.constant 0 : i32
    return %arg0, %c0_i32 : i32, i32
  }
}

module attributes {stable_mosaic.version = 11 : i64} {
  func.func @_edge_kernel(%arg0: i32, %arg1: i32, %arg2: memref<128x128xbf16, #tpu.memory_space<vmem>>, %arg3: memref<1x128xf32, #tpu.memory_space<vmem>>, %arg4: memref<1x128xf32, #tpu.memory_space<vmem>>, %arg5: memref<128x128xbf16, #tpu.memory_space<vmem>>, %arg6: memref<128x128xbf16, #tpu.memory_space<vmem>>, %arg7: memref<128x128xbf16, #tpu.memory_space<vmem>>, %arg8: memref<128x128xbf16, #tpu.memory_space<vmem>>, %arg9: memref<128x128xf32, #tpu.memory_space<vmem>>) attributes {dimension_semantics = [#tpu.dimension_semantics<parallel>, #tpu.dimension_semantics<arbitrary>], iteration_bounds = array<i64: 1, 1>, scalar_prefetch = 0 : i64, scratch_operands = 1 : i64, tpu.core_type = #tpu.core_type<tc>, window_params = [{transform_indices = @transform_0, window_bounds = array<i64: 128, 128>}, {transform_indices = @transform_1, window_bounds = array<i64: 1, 128>}, {transform_indices = @transform_2, window_bounds = array<i64: 1, 128>}, {transform_indices = @transform_3, window_bounds = array<i64: 128, 128>}, {pipeline_mode = #tpu.pipeline_mode<synchronous>, transform_indices = @transform_4, window_bounds = array<i64: 128, 128>}, {transform_indices = @transform_5, window_bounds = array<i64: 128, 128>}, {transform_indices = @transform_6, window_bounds = array<i64: 128, 128>}]} {
    %c0_i32 = arith.constant 0 : i32
    %0 = arith.cmpi eq, %arg1, %c0_i32 : i32
    %1 = arith.extui %0 : i1 to i32
    %c0_i32_0 = arith.constant 0 : i32
    %2 = arith.cmpi ne, %1, %c0_i32_0 : i32
    scf.if %2 {
      %cst_17 = arith.constant 0.000000e+00 : f32
      %27 = vector.broadcast %cst_17 : f32 to vector<128x128xf32>
      %c0_18 = arith.constant 0 : index
      %c0_19 = arith.constant 0 : index
      %28 = vector.load %arg9[%c0_18, %c0_19] : memref<128x128xf32, #tpu.memory_space<vmem>>, vector<128x128xf32>
      tpu.vector_store %arg9[%c0_18, %c0_19], %27 {strides = array<i32>} : memref<128x128xf32, #tpu.memory_space<vmem>>, vector<128x128xf32>,
    } else {
    }
    %c0 = arith.constant 0 : index
    %c0_1 = arith.constant 0 : index
    %3 = vector.load %arg2[%c0, %c0_1] : memref<128x128xbf16, #tpu.memory_space<vmem>>, vector<128x128xbf16>
    %4 = arith.extf %3 : vector<128x128xbf16> to vector<128x128xf32>
    %c0_2 = arith.constant 0 : index
    %c0_3 = arith.constant 0 : index
    %5 = vector.load %arg4[%c0_2, %c0_3] : memref<1x128xf32, #tpu.memory_space<vmem>>, vector<1x128xf32>
    %cst = arith.constant 1.000000e+00 : f32
    %6 = vector.broadcast %cst : f32 to vector<1x128xf32>
    %7 = arith.divf %6, %5 : vector<1x128xf32>
    %c0_4 = arith.constant 0 : index
    %c0_5 = arith.constant 0 : index
    %8 = vector.load %arg3[%c0_4, %c0_5] : memref<1x128xf32, #tpu.memory_space<vmem>>, vector<1x128xf32>
    %9 = vector.broadcast %8 : vector<1x128xf32> to vector<128x128xf32>
    %10 = arith.subf %4, %9 : vector<128x128xf32>
    %11 = math.exp %10 : vector<128x128xf32>
    %12 = vector.broadcast %7 : vector<1x128xf32> to vector<128x128xf32>
    %13 = arith.mulf %11, %12 : vector<128x128xf32>
    %14 = arith.truncf %13 : vector<128x128xf32> to vector<128x128xbf16>
    %15 = tpu.transpose %14, [1, 0] : vector<128x128xbf16> -> vector<128x128xbf16>
    %c0_6 = arith.constant 0 : index
    %c0_7 = arith.constant 0 : index
    %16 = vector.load %arg8[%c0_6, %c0_7] : memref<128x128xbf16, #tpu.memory_space<vmem>>, vector<128x128xbf16>
    tpu.vector_store %arg8[%c0_6, %c0_7], %15 {strides = array<i32>} : memref<128x128xbf16, #tpu.memory_space<vmem>>, vector<128x128xbf16>,
    %c0_8 = arith.constant 0 : index
    %c0_9 = arith.constant 0 : index
    %17 = vector.load %arg9[%c0_8, %c0_9] : memref<128x128xf32, #tpu.memory_space<vmem>>, vector<128x128xf32>
    %18 = arith.extf %15 : vector<128x128xbf16> to vector<128x128xf32>
    %c0_10 = arith.constant 0 : index
    %c0_11 = arith.constant 0 : index
    %19 = vector.load %arg5[%c0_10, %c0_11] : memref<128x128xbf16, #tpu.memory_space<vmem>>, vector<128x128xbf16>
    %20 = arith.extf %19 : vector<128x128xbf16> to vector<128x128xf32>
    %cst_12 = arith.constant dense<0.000000e+00> : vector<128x128xf32>
    %21 = tpu.matmul %18, %20, %cst_12 {dimension_numbers = #tpu.dot_dimension_numbers<[1], [0], [0], [1], [0, 0, 1, 1], [], []>} : vector<128x128xf32>, vector<128x128xf32>, vector<128x128xf32> -> vector<128x128xf32>
    %22 = arith.addf %17, %21 : vector<128x128xf32>
    %c0_13 = arith.constant 0 : index
    %c0_14 = arith.constant 0 : index
    %23 = vector.load %arg9[%c0_13, %c0_14] : memref<128x128xf32, #tpu.memory_space<vmem>>, vector<128x128xf32>
    tpu.vector_store %arg9[%c0_13, %c0_14], %22 {strides = array<i32>} : memref<128x128xf32, #tpu.memory_space<vmem>>, vector<128x128xf32>,
    %c0_i32_15 = arith.constant 0 : i32
    %24 = arith.cmpi eq, %arg1, %c0_i32_15 : i32
    %25 = arith.extui %24 : i1 to i32
    %c0_i32_16 = arith.constant 0 : i32
    %26 = arith.cmpi ne, %25, %c0_i32_16 : i32
    scf.if %26 {
      %c0_17 = arith.constant 0 : index
      %c0_18 = arith.constant 0 : index
      %27 = vector.load %arg9[%c0_17, %c0_18] : memref<128x128xf32, #tpu.memory_space<vmem>>, vector<128x128xf32>
      %cst_19 = arith.constant 0.000000e+00 : f32
      %28 = vector.broadcast %cst_19 : f32 to vector<128x128xf32>
      %29 = arith.maximumf %27, %28 : vector<128x128xf32>
      %c0_20 = arith.constant 0 : index
      %c0_21 = arith.constant 0 : index
      %30 = vector.load %arg6[%c0_20, %c0_21] : memref<128x128xbf16, #tpu.memory_space<vmem>>, vector<128x128xbf16>
      %31 = arith.extf %30 : vector<128x128xbf16> to vector<128x128xf32>
      %cst_22 = arith.constant dense<0.000000e+00> : vector<128x128xf32>
      %32 = tpu.matmul %29, %31, %cst_22 {dimension_numbers = #tpu.dot_dimension_numbers<[1], [0], [0], [1], [0, 0, 1, 1], [], []>} : vector<128x128xf32>, vector<128x128xf32>, vector<128x128xf32> -> vector<128x128xf32>
      %33 = arith.truncf %32 : vector<128x128xf32> to vector<128x128xbf16>
      %c0_23 = arith.constant 0 : index
      %c0_24 = arith.constant 0 : index
      %34 = vector.load %arg7[%c0_23, %c0_24] : memref<128x128xbf16, #tpu.memory_space<vmem>>, vector<128x128xbf16>
      tpu.vector_store %arg7[%c0_23, %c0_24], %33 {strides = array<i32>} : memref<128x128xbf16, #tpu.memory_space<vmem>>, vector<128x128xbf16>,
    } else {
    }
    return
  }
  func.func @transform_0(%arg0: i32, %arg1: i32) -> (i32, i32) {
    %c0_i32 = arith.constant 0 : i32
    return %arg1, %arg0 : i32, i32
  }
  func.func @transform_1(%arg0: i32, %arg1: i32) -> (i32, i32) {
    %c0_i32 = arith.constant 0 : i32
    %c0_i32_0 = arith.constant 0 : i32
    return %c0_i32, %arg0 : i32, i32
  }
  func.func @transform_2(%arg0: i32, %arg1: i32) -> (i32, i32) {
    %c0_i32 = arith.constant 0 : i32
    %c0_i32_0 = arith.constant 0 : i32
    return %c0_i32, %arg0 : i32, i32
  }
  func.func @transform_3(%arg0: i32, %arg1: i32) -> (i32, i32) {
    %c0_i32 = arith.constant 0 : i32
    %c0_i32_0 = arith.constant 0 : i32
    return %arg1, %c0_i32 : i32, i32
  }
  func.func @transform_4(%arg0: i32, %arg1: i32) -> (i32, i32) {
    %c0_i32 = arith.constant 0 : i32
    %c0_i32_0 = arith.constant 0 : i32
    %c0_i32_1 = arith.constant 0 : i32
    return %c0_i32, %c0_i32_0 : i32, i32
  }
  func.func @transform_5(%arg0: i32, %arg1: i32) -> (i32, i32) {
    %c0_i32 = arith.constant 0 : i32
    %c0_i32_0 = arith.constant 0 : i32
    return %arg0, %c0_i32 : i32, i32
  }
  func.func @transform_6(%arg0: i32, %arg1: i32) -> (i32, i32) {
    %c0_i32 = arith.constant 0 : i32
    return %arg0, %arg1 : i32, i32
  }
}

module attributes {stable_mosaic.version = 11 : i64} {
  func.func @_edge_out_kernel(%arg0: i32, %arg1: i32, %arg2: memref<128x128xbf16, #tpu.memory_space<vmem>>, %arg3: memref<128x128xbf16, #tpu.memory_space<vmem>>, %arg4: memref<128x128xf32, #tpu.memory_space<vmem>>) attributes {dimension_semantics = [#tpu.dimension_semantics<parallel>, #tpu.dimension_semantics<arbitrary>], iteration_bounds = array<i64: 1, 1>, scalar_prefetch = 0 : i64, scratch_operands = 0 : i64, tpu.core_type = #tpu.core_type<tc>, window_params = [{transform_indices = @transform_0, window_bounds = array<i64: 128, 128>}, {transform_indices = @transform_1, window_bounds = array<i64: 128, 128>}, {transform_indices = @transform_2, window_bounds = array<i64: 128, 128>}]} {
    %c0_i32 = arith.constant 0 : i32
    %0 = arith.cmpi eq, %arg1, %c0_i32 : i32
    %1 = arith.extui %0 : i1 to i32
    %c0_i32_0 = arith.constant 0 : i32
    %2 = arith.cmpi ne, %1, %c0_i32_0 : i32
    scf.if %2 {
      %cst_10 = arith.constant 0.000000e+00 : f32
      %14 = vector.broadcast %cst_10 : f32 to vector<128x128xf32>
      %c0_11 = arith.constant 0 : index
      %c0_12 = arith.constant 0 : index
      %15 = vector.load %arg4[%c0_11, %c0_12] : memref<128x128xf32, #tpu.memory_space<vmem>>, vector<128x128xf32>
      tpu.vector_store %arg4[%c0_11, %c0_12], %14 {strides = array<i32>} : memref<128x128xf32, #tpu.memory_space<vmem>>, vector<128x128xf32>,
    } else {
    }
    %c0 = arith.constant 0 : index
    %c0_1 = arith.constant 0 : index
    %3 = vector.load %arg4[%c0, %c0_1] : memref<128x128xf32, #tpu.memory_space<vmem>>, vector<128x128xf32>
    %c0_2 = arith.constant 0 : index
    %c0_3 = arith.constant 0 : index
    %4 = vector.load %arg2[%c0_2, %c0_3] : memref<128x128xbf16, #tpu.memory_space<vmem>>, vector<128x128xbf16>
    %5 = arith.extf %4 : vector<128x128xbf16> to vector<128x128xf32>
    %c0_4 = arith.constant 0 : index
    %c0_5 = arith.constant 0 : index
    %6 = vector.load %arg3[%c0_4, %c0_5] : memref<128x128xbf16, #tpu.memory_space<vmem>>, vector<128x128xbf16>
    %7 = arith.extf %6 : vector<128x128xbf16> to vector<128x128xf32>
    %cst = arith.constant dense<0.000000e+00> : vector<128x128xf32>
    %8 = tpu.matmul %5, %7, %cst {dimension_numbers = #tpu.dot_dimension_numbers<[1], [0], [0], [1], [0, 0, 1, 1], [], []>} : vector<128x128xf32>, vector<128x128xf32>, vector<128x128xf32> -> vector<128x128xf32>
    %9 = arith.addf %3, %8 : vector<128x128xf32>
    %c0_6 = arith.constant 0 : index
    %c0_7 = arith.constant 0 : index
    %10 = vector.load %arg4[%c0_6, %c0_7] : memref<128x128xf32, #tpu.memory_space<vmem>>, vector<128x128xf32>
    tpu.vector_store %arg4[%c0_6, %c0_7], %9 {strides = array<i32>} : memref<128x128xf32, #tpu.memory_space<vmem>>, vector<128x128xf32>,
    %c0_i32_8 = arith.constant 0 : i32
    %11 = arith.cmpi eq, %arg1, %c0_i32_8 : i32
    %12 = arith.extui %11 : i1 to i32
    %c0_i32_9 = arith.constant 0 : i32
    %13 = arith.cmpi ne, %12, %c0_i32_9 : i32
    scf.if %13 {
      %c0_10 = arith.constant 0 : index
      %c0_11 = arith.constant 0 : index
      %14 = vector.load %arg4[%c0_10, %c0_11] : memref<128x128xf32, #tpu.memory_space<vmem>>, vector<128x128xf32>
      %cst_12 = arith.constant 0.000000e+00 : f32
      %15 = vector.broadcast %cst_12 : f32 to vector<128x128xf32>
      %16 = arith.maximumf %14, %15 : vector<128x128xf32>
      %c0_13 = arith.constant 0 : index
      %c0_14 = arith.constant 0 : index
      %17 = vector.load %arg4[%c0_13, %c0_14] : memref<128x128xf32, #tpu.memory_space<vmem>>, vector<128x128xf32>
      tpu.vector_store %arg4[%c0_13, %c0_14], %16 {strides = array<i32>} : memref<128x128xf32, #tpu.memory_space<vmem>>, vector<128x128xf32>,
    } else {
    }
    return
  }
  func.func @transform_0(%arg0: i32, %arg1: i32) -> (i32, i32) {
    %c0_i32 = arith.constant 0 : i32
    return %arg0, %arg1 : i32, i32
  }
  func.func @transform_1(%arg0: i32, %arg1: i32) -> (i32, i32) {
    %c0_i32 = arith.constant 0 : i32
    %c0_i32_0 = arith.constant 0 : i32
    return %arg1, %c0_i32 : i32, i32
  }
  func.func @transform_2(%arg0: i32, %arg1: i32) -> (i32, i32) {
    %c0_i32 = arith.constant 0 : i32
    %c0_i32_0 = arith.constant 0 : i32
    return %arg0, %c0_i32 : i32, i32
  }
}

</mosaic_0001>

<bundles_post_ra>
// kernel: hgat_forward.7
= control target key start
LH: loop header
LB: loop body
LE: loop exit
PB: predicated region body
PF: predicated region fallthrough
CT: control target
= control target key end

     0   :  { %s669_s1 = inlined_call_operand.vmem [shape: bf16[128,128], index: 1, kind: input, shape index: {}]   ;;  %s670_s0 = inlined_call_operand.vmem [shape: bf16[128,128], index: 0, kind: input, shape index: {}]   ;;  %s671_s2 = inlined_call_operand.vmem [shape: f32[128,128], index: 2, kind: output, shape index: {}]  }
   0x1   :  { %v376_v0 = vld [vmem:[%s669_s1] sm:$0xff]   ;;  %v414_v1 = vld [vmem:[%s669_s1 + $0x8] sm:$0xff]   ;;  %v415_v5 = vld [vmem:[%s669_s1 + $0x10] sm:$0xff]  }
   0x2   :  { %510 = vmatprep.subr.bf16.mxu0 %v376_v0  ;;  %541 = vmatprep.subr.bf16.mxu1 %v376_v0  ;;  %v344_v2 = vld [vmem:[%s670_s0] sm:$0xff]   ;;  %v416_v7 = vld [vmem:[%s669_s1 + $0x18] sm:$0xff]   ;;  %v418_v9 = vld [vmem:[%s669_s1 + $0x28] sm:$0xff]  }
   0x3   :  { %512 = vmatpush3.bf16.msra.mxu0 %v376_v0  ;;  %549 = vmatpush3.bf16.msra.mxu1 %v376_v0  ;;  %v345_v3 = vunpack.c.l.bf16 %v344_v2  ;;  %v410_v4 = vld [vmem:[%s670_s0 + $0x20] sm:$0xff]   ;;  %v419_v10 = vld [vmem:[%s669_s1 + $0x30] sm:$0xff]   ;;  %v420_v11 = vld [vmem:[%s669_s1 + $0x38] sm:$0xff]   ;;  %v346_v14 = vunpack.c.h.bf16 %v344_v2 }
   0x4   :  { %514 = vmatprep.subr.bf16.mxu0 %v414_v1  ;;  %542 = vmatprep.subr.bf16.mxu1 %v414_v1  ;;  %v361_v6 = vunpack.c.l.bf16 %v410_v4  ;;  %v417_v8 = vld [vmem:[%s669_s1 + $0x20] sm:$0xff]   ;;  %v407_v12 = vld [vmem:[%s670_s0 + $0x8] sm:$0xff]   ;;  %v362_v15 = vunpack.c.h.bf16 %v410_v4  ;;  %v408_v18 = vld [vmem:[%s670_s0 + $0x10] sm:$0xff]  }
   0x5   :  { %485 = vmatprep.mubr.f32.mxu0 %v345_v3  ;;  %v411_v13 = vld [vmem:[%s670_s0 + $0x28] sm:$0xff]   ;;  %v349_v16 = vunpack.c.l.bf16 %v407_v12  ;;  %v412_v19 = vld [vmem:[%s670_s0 + $0x30] sm:$0xff]   ;;  %v350_v20 = vunpack.c.h.bf16 %v407_v12  ;;  %v353_v22 = vunpack.c.l.bf16 %v408_v18  ;;  %v409_v24 = vld [vmem:[%s670_s0 + $0x18] sm:$0xff]   ;;  %v354_v26 = vunpack.c.h.bf16 %v408_v18 }
   0x6   :  { %497 = vmatprep.mubr.f32.mxu1 %v361_v6  ;;  %v365_v17 = vunpack.c.l.bf16 %v411_v13  ;;  %v366_v21 = vunpack.c.h.bf16 %v411_v13  ;;  %v369_v23 = vunpack.c.l.bf16 %v412_v19  ;;  %v413_v25 = vld [vmem:[%s670_s0 + $0x38] sm:$0xff]   ;;  %v370_v27 = vunpack.c.h.bf16 %v412_v19 }
   0x7   :  { %516 = vmatpush3.bf16.msra.mxu0 %v414_v1  ;;  %550 = vmatpush3.bf16.msra.mxu1 %v414_v1  ;;  %v357_v28 = vunpack.c.l.bf16 %v409_v24  ;;  %v373_v29 = vunpack.c.l.bf16 %v413_v25  ;;  %v358_v30 = vunpack.c.h.bf16 %v409_v24  ;;  %v374_v31 = vunpack.c.h.bf16 %v413_v25 }
   0x8   :  { %518 = vmatprep.subr.bf16.mxu0 %v415_v5  ;;  %543 = vmatprep.subr.bf16.mxu1 %v415_v5 }
   0xb   :  { %520 = vmatpush3.bf16.msra.mxu0 %v415_v5  ;;  %551 = vmatpush3.bf16.msra.mxu1 %v415_v5 }
   0xc   :  { %522 = vmatprep.subr.bf16.mxu0 %v416_v7  ;;  %544 = vmatprep.subr.bf16.mxu1 %v416_v7 }
   0xf   :  { %524 = vmatpush3.bf16.msra.mxu0 %v416_v7  ;;  %552 = vmatpush3.bf16.msra.mxu1 %v416_v7 }
  0x10   :  { %526 = vmatprep.subr.bf16.mxu0 %v417_v8  ;;  %545 = vmatprep.subr.bf16.mxu1 %v417_v8 }
  0x13   :  { %528 = vmatpush3.bf16.msra.mxu0 %v417_v8  ;;  %553 = vmatpush3.bf16.msra.mxu1 %v417_v8 }
  0x14   :  { %530 = vmatprep.subr.bf16.mxu0 %v418_v9  ;;  %546 = vmatprep.subr.bf16.mxu1 %v418_v9 }
  0x17   :  { %532 = vmatpush3.bf16.msra.mxu0 %v418_v9  ;;  %554 = vmatpush3.bf16.msra.mxu1 %v418_v9 }
  0x18   :  { %534 = vmatprep.subr.bf16.mxu0 %v419_v10  ;;  %547 = vmatprep.subr.bf16.mxu1 %v419_v10 }
  0x1b   :  { %536 = vmatpush3.bf16.msra.mxu0 %v419_v10  ;;  %555 = vmatpush3.bf16.msra.mxu1 %v419_v10 }
  0x1c   :  { %538 = vmatprep.subr.bf16.mxu0 %v420_v11  ;;  %548 = vmatprep.subr.bf16.mxu1 %v420_v11 }
  0x1f   :  { %540 = vmatpush3.bf16.msra.mxu0 %v420_v11  ;;  %556 = vmatpush3.bf16.msra.mxu1 %v420_v11 }
  0x22   :  { %486 = vmatmul.mubr.f32.vlgmr.msra.gmra.mrb[0].mxu0 %v346_v14  ;;  %498 = vmatmul.mubr.f32.vlgmr.msra.gmra.mrb[0].mxu1 %v362_v15 }
  0x23   :  { %488 = vmatprep.mubr.f32.mxu0 %v349_v16  ;;  %500 = vmatprep.mubr.f32.mxu1 %v365_v17 }
  0x26   :  { %489 = vmatmul.mubr.f32.gmra.mrb[2].mxu0 %v350_v20  ;;  %501 = vmatmul.mubr.f32.gmra.mrb[2].mxu1 %v366_v21 }
  0x27   :  { %491 = vmatprep.mubr.f32.mxu0 %v353_v22  ;;  %503 = vmatprep.mubr.f32.mxu1 %v369_v23 }
  0x2a   :  { %492 = vmatmul.mubr.f32.gmra.mrb[4].mxu0 %v354_v26  ;;  %504 = vmatmul.mubr.f32.gmra.mrb[4].mxu1 %v370_v27 }
  0x2b   :  { %494 = vmatprep.mubr.f32.mxu0 %v357_v28  ;;  %506 = vmatprep.mubr.f32.mxu1 %v373_v29 }
  0x2e   :  { %495 = vmatmul.mubr.f32.gmra.mrb[6].mxu0 %v358_v30  ;;  %507 = vmatmul.mubr.f32.gmra.mrb[6].mxu1 %v374_v31 }
  0xf5   :  { %v487_v32 = vpop.f32.mrb[0].mxu0  ;;  %v499_v33 = vpop.f32.mrb[0].mxu1 }
  0xf6   :  { %v177_v34 = vpop.f32.mrb[1].mxu0  ;;  %v217_v35 = vpop.f32.mrb[1].mxu1  ;;  %v308_v36 = vmax.f32 %v487_v32, 0.0  ;;  %v316_v37 = vmax.f32 %v499_v33, 0.0 }
  0xf7   :  { %v307_v38 = vmax.f32 %v177_v34, 0.0  ;;  %v315_v39 = vmax.f32 %v217_v35, 0.0 }
  0xf8   :  { %324 = vst [vmem:[%s671_s2 + $0x8] sm:$0xff] %v308_v36  ;;  %332 = vst [vmem:[%s671_s2 + $0x48] sm:$0xff] %v316_v37 }
  0xf9   :  { %v490_v40 = vpop.f32.mrb[2].mxu0  ;;  %v502_v41 = vpop.f32.mrb[2].mxu1  ;;  %323 = vst [vmem:[%s671_s2] sm:$0xff] %v307_v38  ;;  %331 = vst [vmem:[%s671_s2 + $0x40] sm:$0xff] %v315_v39 }
  0xfa   :  { %v187_v42 = vpop.f32.mrb[3].mxu0  ;;  %v227_v43 = vpop.f32.mrb[3].mxu1  ;;  %v310_v44 = vmax.f32 %v490_v40, 0.0  ;;  %v318_v45 = vmax.f32 %v502_v41, 0.0 }
  0xfb   :  { %v309_v46 = vmax.f32 %v187_v42, 0.0  ;;  %v317_v47 = vmax.f32 %v227_v43, 0.0 }
  0xfc   :  { %326 = vst [vmem:[%s671_s2 + $0x18] sm:$0xff] %v310_v44  ;;  %334 = vst [vmem:[%s671_s2 + $0x58] sm:$0xff] %v318_v45 }
  0xfd   :  { %v493_v48 = vpop.f32.mrb[4].mxu0  ;;  %v505_v49 = vpop.f32.mrb[4].mxu1  ;;  %325 = vst [vmem:[%s671_s2 + $0x10] sm:$0xff] %v309_v46  ;;  %333 = vst [vmem:[%s671_s2 + $0x50] sm:$0xff] %v317_v47 }
  0xfe   :  { %v197_v50 = vpop.f32.mrb[5].mxu0  ;;  %v237_v51 = vpop.f32.mrb[5].mxu1  ;;  %v312_v52 = vmax.f32 %v493_v48, 0.0  ;;  %v320_v53 = vmax.f32 %v505_v49, 0.0 }
  0xff   :  { %v311_v54 = vmax.f32 %v197_v50, 0.0  ;;  %v319_v55 = vmax.f32 %v237_v51, 0.0 }
 0x100   :  { %328 = vst [vmem:[%s671_s2 + $0x28] sm:$0xff] %v312_v52  ;;  %336 = vst [vmem:[%s671_s2 + $0x68] sm:$0xff] %v320_v53 }
 0x101   :  { %v496_v56 = vpop.f32.mrb[6].mxu0  ;;  %v508_v57 = vpop.f32.mrb[6].mxu1  ;;  %327 = vst [vmem:[%s671_s2 + $0x20] sm:$0xff] %v311_v54  ;;  %335 = vst [vmem:[%s671_s2 + $0x60] sm:$0xff] %v319_v55 }
 0x102   :  { %v207_v58 = vpop.f32.mrb[7].mxu0  ;;  %v247_v59 = vpop.f32.mrb[7].mxu1  ;;  %v314_v60 = vmax.f32 %v496_v56, 0.0  ;;  %v322_v61 = vmax.f32 %v508_v57, 0.0 }
 0x103   :  { %v313_v62 = vmax.f32 %v207_v58, 0.0  ;;  %v321_v63 = vmax.f32 %v247_v59, 0.0 }
 0x104   :  { %330 = vst [vmem:[%s671_s2 + $0x38] sm:$0xff] %v314_v60  ;;  %338 = vst [vmem:[%s671_s2 + $0x78] sm:$0xff] %v322_v61 }
 0x105   :  { %329 = vst [vmem:[%s671_s2 + $0x30] sm:$0xff] %v313_v62  ;;  %337 = vst [vmem:[%s671_s2 + $0x70] sm:$0xff] %v321_v63 }

// kernel: hgat_forward.6
= control target key start
LH: loop header
LB: loop body
LE: loop exit
PB: predicated region body
PF: predicated region fallthrough
CT: control target
= control target key end

     0   :  { %s863_s1 = inlined_call_operand.vmem [shape: bf16[128,128], index: 1, kind: input, shape index: {}]   ;;  %s864_s0 = inlined_call_operand.vmem [shape: bf16[128,128], index: 0, kind: input, shape index: {}]   ;;  %s865_s2 = inlined_call_operand.vmem [shape: f32[128,128], index: 2, kind: output, shape index: {0}]   ;;  %s866_s3 = inlined_call_operand.vmem [shape: bf16[128,128], index: 3, kind: output, shape index: {1}]  }
   0x1   :  { %v494_v0 = vld [vmem:[%s863_s1] sm:$0xff]   ;;  %v572_v1 = vld [vmem:[%s863_s1 + $0x8] sm:$0xff]   ;;  %v573_v5 = vld [vmem:[%s863_s1 + $0x10] sm:$0xff]  }
   0x2   :  { %675 = vmatprep.subr.bf16.mxu0 %v494_v0  ;;  %706 = vmatprep.subr.bf16.mxu1 %v494_v0  ;;  %v462_v2 = vld [vmem:[%s864_s0] sm:$0xff]   ;;  %v574_v7 = vld [vmem:[%s863_s1 + $0x18] sm:$0xff]   ;;  %v576_v9 = vld [vmem:[%s863_s1 + $0x28] sm:$0xff]  }
   0x3   :  { %677 = vmatpush3.bf16.msra.mxu0 %v494_v0  ;;  %714 = vmatpush3.bf16.msra.mxu1 %v494_v0  ;;  %v463_v3 = vunpack.c.l.bf16 %v462_v2  ;;  %v568_v4 = vld [vmem:[%s864_s0 + $0x20] sm:$0xff]   ;;  %v577_v10 = vld [vmem:[%s863_s1 + $0x30] sm:$0xff]   ;;  %v578_v11 = vld [vmem:[%s863_s1 + $0x38] sm:$0xff]   ;;  %v464_v14 = vunpack.c.h.bf16 %v462_v2 }
   0x4   :  { %679 = vmatprep.subr.bf16.mxu0 %v572_v1  ;;  %707 = vmatprep.subr.bf16.mxu1 %v572_v1  ;;  %v479_v6 = vunpack.c.l.bf16 %v568_v4  ;;  %v575_v8 = vld [vmem:[%s863_s1 + $0x20] sm:$0xff]   ;;  %v565_v12 = vld [vmem:[%s864_s0 + $0x8] sm:$0xff]   ;;  %v480_v15 = vunpack.c.h.bf16 %v568_v4  ;;  %v566_v18 = vld [vmem:[%s864_s0 + $0x10] sm:$0xff]  }
   0x5   :  { %650 = vmatprep.mubr.f32.mxu0 %v463_v3  ;;  %v569_v13 = vld [vmem:[%s864_s0 + $0x28] sm:$0xff]   ;;  %v467_v16 = vunpack.c.l.bf16 %v565_v12  ;;  %v570_v19 = vld [vmem:[%s864_s0 + $0x30] sm:$0xff]   ;;  %v468_v20 = vunpack.c.h.bf16 %v565_v12  ;;  %v471_v22 = vunpack.c.l.bf16 %v566_v18  ;;  %v567_v24 = vld [vmem:[%s864_s0 + $0x18] sm:$0xff]   ;;  %v472_v26 = vunpack.c.h.bf16 %v566_v18 }
   0x6   :  { %662 = vmatprep.mubr.f32.mxu1 %v479_v6  ;;  %v483_v17 = vunpack.c.l.bf16 %v569_v13  ;;  %v484_v21 = vunpack.c.h.bf16 %v569_v13  ;;  %v487_v23 = vunpack.c.l.bf16 %v570_v19  ;;  %v571_v25 = vld [vmem:[%s864_s0 + $0x38] sm:$0xff]   ;;  %v488_v27 = vunpack.c.h.bf16 %v570_v19 }
   0x7   :  { %681 = vmatpush3.bf16.msra.mxu0 %v572_v1  ;;  %715 = vmatpush3.bf16.msra.mxu1 %v572_v1  ;;  %v475_v28 = vunpack.c.l.bf16 %v567_v24  ;;  %v491_v29 = vunpack.c.l.bf16 %v571_v25  ;;  %v476_v30 = vunpack.c.h.bf16 %v567_v24  ;;  %v492_v31 = vunpack.c.h.bf16 %v571_v25 }
   0x8   :  { %683 = vmatprep.subr.bf16.mxu0 %v573_v5  ;;  %708 = vmatprep.subr.bf16.mxu1 %v573_v5 }
   0xb   :  { %685 = vmatpush3.bf16.msra.mxu0 %v573_v5  ;;  %716 = vmatpush3.bf16.msra.mxu1 %v573_v5 }
   0xc   :  { %687 = vmatprep.subr.bf16.mxu0 %v574_v7  ;;  %709 = vmatprep.subr.bf16.mxu1 %v574_v7 }
   0xf   :  { %689 = vmatpush3.bf16.msra.mxu0 %v574_v7  ;;  %717 = vmatpush3.bf16.msra.mxu1 %v574_v7 }
  0x10   :  { %691 = vmatprep.subr.bf16.mxu0 %v575_v8  ;;  %710 = vmatprep.subr.bf16.mxu1 %v575_v8 }
  0x13   :  { %693 = vmatpush3.bf16.msra.mxu0 %v575_v8  ;;  %718 = vmatpush3.bf16.msra.mxu1 %v575_v8 }
  0x14   :  { %695 = vmatprep.subr.bf16.mxu0 %v576_v9  ;;  %711 = vmatprep.subr.bf16.mxu1 %v576_v9 }
  0x17   :  { %697 = vmatpush3.bf16.msra.mxu0 %v576_v9  ;;  %719 = vmatpush3.bf16.msra.mxu1 %v576_v9 }
  0x18   :  { %699 = vmatprep.subr.bf16.mxu0 %v577_v10  ;;  %712 = vmatprep.subr.bf16.mxu1 %v577_v10 }
  0x1b   :  { %701 = vmatpush3.bf16.msra.mxu0 %v577_v10  ;;  %720 = vmatpush3.bf16.msra.mxu1 %v577_v10 }
  0x1c   :  { %703 = vmatprep.subr.bf16.mxu0 %v578_v11  ;;  %713 = vmatprep.subr.bf16.mxu1 %v578_v11 }
  0x1f   :  { %705 = vmatpush3.bf16.msra.mxu0 %v578_v11  ;;  %721 = vmatpush3.bf16.msra.mxu1 %v578_v11 }
  0x22   :  { %651 = vmatmul.mubr.f32.vlgmr.msra.gmra.mrb[0].mxu0 %v464_v14  ;;  %663 = vmatmul.mubr.f32.vlgmr.msra.gmra.mrb[0].mxu1 %v480_v15 }
  0x23   :  { %653 = vmatprep.mubr.f32.mxu0 %v467_v16  ;;  %665 = vmatprep.mubr.f32.mxu1 %v483_v17 }
  0x26   :  { %654 = vmatmul.mubr.f32.gmra.mrb[2].mxu0 %v468_v20  ;;  %666 = vmatmul.mubr.f32.gmra.mrb[2].mxu1 %v484_v21 }
  0x27   :  { %656 = vmatprep.mubr.f32.mxu0 %v471_v22  ;;  %668 = vmatprep.mubr.f32.mxu1 %v487_v23 }
  0x2a   :  { %657 = vmatmul.mubr.f32.gmra.mrb[4].mxu0 %v472_v26  ;;  %669 = vmatmul.mubr.f32.gmra.mrb[4].mxu1 %v488_v27 }
  0x2b   :  { %659 = vmatprep.mubr.f32.mxu0 %v475_v28  ;;  %671 = vmatprep.mubr.f32.mxu1 %v491_v29 }
  0x2e   :  { %660 = vmatmul.mubr.f32.gmra.mrb[6].mxu0 %v476_v30  ;;  %672 = vmatmul.mubr.f32.gmra.mrb[6].mxu1 %v492_v31 }
  0xf5   :  { %v652_v32 = vpop.f32.mrb[0].mxu0  ;;  %v664_v33 = vpop.f32.mrb[0].mxu1 }
  0xf6   :  { %v179_v34 = vpop.f32.mrb[1].mxu0  ;;  %v219_v35 = vpop.f32.mrb[1].mxu1  ;;  %v310_v36 = vmax.f32 %v652_v32, 0.0  ;;  %v318_v37 = vmax.f32 %v664_v33, 0.0 }
  0xf7   :  { %v309_v38 = vmax.f32 %v179_v34, 0.0  ;;  %v317_v39 = vmax.f32 %v219_v35, 0.0 }
  0xf8   :  { %326 = vst [vmem:[%s865_s2 + $0x8] sm:$0xff] %v310_v36  ;;  %334 = vst [vmem:[%s865_s2 + $0x48] sm:$0xff] %v318_v37 }
  0xf9   :  { %v655_v40 = vpop.f32.mrb[2].mxu0  ;;  %v667_v41 = vpop.f32.mrb[2].mxu1  ;;  %325 = vst [vmem:[%s865_s2] sm:$0xff] %v309_v38  ;;  %v528_v44 = vpack.c.bf16 %v310_v36, %v309_v38  ;;  %333 = vst [vmem:[%s865_s2 + $0x40] sm:$0xff] %v317_v39  ;;  %v548_v45 = vpack.c.bf16 %v318_v37, %v317_v39 }
  0xfa   :  { %v189_v42 = vpop.f32.mrb[3].mxu0  ;;  %v229_v43 = vpop.f32.mrb[3].mxu1  ;;  %v312_v46 = vmax.f32 %v655_v40, 0.0  ;;  %v320_v47 = vmax.f32 %v667_v41, 0.0 }
  0xfb   :  { %529 = vst [vmem:[%s866_s3] sm:$0xff] %v528_v44   ;;  %582 = vst [vmem:[%s866_s3 + $0x20] sm:$0xff] %v548_v45   ;;  %v311_v48 = vmax.f32 %v189_v42, 0.0  ;;  %v319_v49 = vmax.f32 %v229_v43, 0.0 }
  0xfc   :  { %328 = vst [vmem:[%s865_s2 + $0x18] sm:$0xff] %v312_v46  ;;  %336 = vst [vmem:[%s865_s2 + $0x58] sm:$0xff] %v320_v47 }
  0xfd   :  { %v658_v50 = vpop.f32.mrb[4].mxu0  ;;  %v670_v51 = vpop.f32.mrb[4].mxu1  ;;  %327 = vst [vmem:[%s865_s2 + $0x10] sm:$0xff] %v311_v48  ;;  %v533_v54 = vpack.c.bf16 %v312_v46, %v311_v48  ;;  %335 = vst [vmem:[%s865_s2 + $0x50] sm:$0xff] %v319_v49  ;;  %v553_v55 = vpack.c.bf16 %v320_v47, %v319_v49 }
  0xfe   :  { %v199_v52 = vpop.f32.mrb[5].mxu0  ;;  %v239_v53 = vpop.f32.mrb[5].mxu1  ;;  %v314_v56 = vmax.f32 %v658_v50, 0.0  ;;  %v322_v57 = vmax.f32 %v670_v51, 0.0 }
  0xff   :  { %579 = vst [vmem:[%s866_s3 + $0x8] sm:$0xff] %v533_v54   ;;  %583 = vst [vmem:[%s866_s3 + $0x28] sm:$0xff] %v553_v55   ;;  %v313_v58 = vmax.f32 %v199_v52, 0.0  ;;  %v321_v59 = vmax.f32 %v239_v53, 0.0 }
 0x100   :  { %330 = vst [vmem:[%s865_s2 + $0x28] sm:$0xff] %v314_v56  ;;  %338 = vst [vmem:[%s865_s2 + $0x68] sm:$0xff] %v322_v57 }
 0x101   :  { %v661_v60 = vpop.f32.mrb[6].mxu0  ;;  %v673_v61 = vpop.f32.mrb[6].mxu1  ;;  %329 = vst [vmem:[%s865_s2 + $0x20] sm:$0xff] %v313_v58  ;;  %v538_v0 = vpack.c.bf16 %v314_v56, %v313_v58  ;;  %337 = vst [vmem:[%s865_s2 + $0x60] sm:$0xff] %v321_v59  ;;  %v558_v1 = vpack.c.bf16 %v322_v57, %v321_v59 }
 0x102   :  { %v209_v62 = vpop.f32.mrb[7].mxu0  ;;  %v249_v63 = vpop.f32.mrb[7].mxu1  ;;  %v316_v2 = vmax.f32 %v661_v60, 0.0  ;;  %v324_v3 = vmax.f32 %v673_v61, 0.0 }
 0x103   :  { %580 = vst [vmem:[%s866_s3 + $0x10] sm:$0xff] %v538_v0   ;;  %584 = vst [vmem:[%s866_s3 + $0x30] sm:$0xff] %v558_v1   ;;  %v315_v4 = vmax.f32 %v209_v62, 0.0  ;;  %v323_v5 = vmax.f32 %v249_v63, 0.0 }
 0x104   :  { %332 = vst [vmem:[%s865_s2 + $0x38] sm:$0xff] %v316_v2  ;;  %340 = vst [vmem:[%s865_s2 + $0x78] sm:$0xff] %v324_v3 }
 0x105   :  { %331 = vst [vmem:[%s865_s2 + $0x30] sm:$0xff] %v315_v4  ;;  %v543_v6 = vpack.c.bf16 %v316_v2, %v315_v4  ;;  %339 = vst [vmem:[%s865_s2 + $0x70] sm:$0xff] %v323_v5  ;;  %v563_v7 = vpack.c.bf16 %v324_v3, %v323_v5 }
 0x107   :  { %581 = vst [vmem:[%s866_s3 + $0x18] sm:$0xff] %v543_v6   ;;  %585 = vst [vmem:[%s866_s3 + $0x38] sm:$0xff] %v563_v7  }

// kernel: hgat_forward.4
= control target key start
LH: loop header
LB: loop body
LE: loop exit
PB: predicated region body
PF: predicated region fallthrough
CT: control target
= control target key end

     0   :  { %s1373_s1 = inlined_call_operand.vmem [shape: bf16[128,128], index: 1, kind: input, shape index: {}]   ;;  %s1374_s2 = inlined_call_operand.vmem [shape: bf16[128,128], index: 2, kind: input, shape index: {}]   ;;  %s1375_s0 = inlined_call_operand.vmem [shape: bf16[128,128], index: 0, kind: input, shape index: {}]   ;;  %s1376_s3 = inlined_call_operand.vmem [shape: bf16[128,128], index: 3, kind: output, shape index: {0}]   ;;  %s1377_s4 = inlined_call_operand.vmem [shape: bf16[128,128], index: 4, kind: output, shape index: {1}]  }
   0x1   :  { %v1088_v0 = vld [vmem:[%s1373_s1] sm:$0xff]   ;;  %v1093_v1 = vld [vmem:[%s1373_s1 + $0x8] sm:$0xff]   ;;  %v1112_v8 = vld [vmem:[%s1373_s1 + $0x10] sm:$0xff]  }
   0x2   :  { %v755_v2 = vunpack.c.l.bf16 %v1088_v0  ;;  %v759_v3 = vunpack.c.l.bf16 %v1093_v1  ;;  %v682_v4 = vld [vmem:[%s1374_s2] sm:$0xff]   ;;  %v756_v5 = vunpack.c.h.bf16 %v1088_v0  ;;  %v760_v6 = vunpack.c.h.bf16 %v1093_v1  ;;  %v832_v7 = vld [vmem:[%s1374_s2 + $0x8] sm:$0xff]   ;;  %v833_v15 = vld [vmem:[%s1374_s2 + $0x10] sm:$0xff]  }
   0x3   :  { %949 = vmatprep.subr.bf16.mxu0 %v682_v4  ;;  %980 = vmatprep.subr.bf16.mxu1 %v682_v4  ;;  %v1117_v9 = vld [vmem:[%s1375_s0] sm:$0xff]   ;;  %v763_v13 = vunpack.c.l.bf16 %v1112_v8  ;;  %v764_v14 = vunpack.c.h.bf16 %v1112_v8  ;;  %v1138_v16 = vld [vmem:[%s1373_s1 + $0x18] sm:$0xff]   ;;  %v1166_v24 = vld [vmem:[%s1373_s1 + $0x28] sm:$0xff]  }
   0x4   :  { %337 = vmax.xlane.f32.xlu0 %v755_v2  ;;  %341 = vmax.xlane.f32.xlu1 %v759_v3  ;;  %v1122_v10 = vld [vmem:[%s1375_s0 + $0x20] sm:$0xff]   ;;  %v651_v11 = vunpack.c.l.bf16 %v1117_v9  ;;  %v767_v17 = vunpack.c.l.bf16 %v1138_v16  ;;  %v768_v18 = vunpack.c.h.bf16 %v1138_v16  ;;  %v834_v19 = vld [vmem:[%s1374_s2 + $0x18] sm:$0xff]   ;;  %v775_v25 = vunpack.c.l.bf16 %v1166_v24  ;;  %v836_v27 = vld [vmem:[%s1374_s2 + $0x28] sm:$0xff]  }
   0x5   :  { %951 = vmatpush3.bf16.msra.mxu0 %v682_v4  ;;  %988 = vmatpush3.bf16.msra.mxu1 %v682_v4  ;;  %v667_v12 = vunpack.c.l.bf16 %v1122_v10  ;;  %v1152_v20 = vld [vmem:[%s1373_s1 + $0x20] sm:$0xff]   ;;  %v776_v26 = vunpack.c.h.bf16 %v1166_v24  ;;  %v1180_v28 = vld [vmem:[%s1373_s1 + $0x30] sm:$0xff]   ;;  %v1194_v32 = vld [vmem:[%s1373_s1 + $0x38] sm:$0xff]   ;;  %v652_v38 = vunpack.c.h.bf16 %v1117_v9  ;;  %v668_v39 = vunpack.c.h.bf16 %v1122_v10 }
   0x6   :  { %953 = vmatprep.subr.bf16.mxu0 %v832_v7  ;;  %981 = vmatprep.subr.bf16.mxu1 %v832_v7  ;;  %v771_v21 = vunpack.c.l.bf16 %v1152_v20  ;;  %v772_v22 = vunpack.c.h.bf16 %v1152_v20  ;;  %v835_v23 = vld [vmem:[%s1374_s2 + $0x20] sm:$0xff]   ;;  %v779_v29 = vunpack.c.l.bf16 %v1180_v28  ;;  %v780_v30 = vunpack.c.h.bf16 %v1180_v28  ;;  %v837_v31 = vld [vmem:[%s1374_s2 + $0x30] sm:$0xff]   ;;  %v838_v35 = vld [vmem:[%s1374_s2 + $0x38] sm:$0xff]  }
   0x7   :  { %924 = vmatprep.mubr.f32.mxu0 %v651_v11  ;;  %936 = vmatprep.mubr.f32.mxu1 %v667_v12  ;;  %v783_v33 = vunpack.c.l.bf16 %v1194_v32  ;;  %v784_v34 = vunpack.c.h.bf16 %v1194_v32  ;;  %v825_v36 = vld [vmem:[%s1375_s0 + $0x8] sm:$0xff]   ;;  %v826_v42 = vld [vmem:[%s1375_s0 + $0x10] sm:$0xff]   ;;  %v827_v48 = vld [vmem:[%s1375_s0 + $0x18] sm:$0xff]  }
   0x8   :  { %339 = vmax.xlane.f32.xlu0 %v756_v5  ;;  %343 = vmax.xlane.f32.xlu1 %v760_v6  ;;  %v829_v37 = vld [vmem:[%s1375_s0 + $0x28] sm:$0xff]   ;;  %v655_v40 = vunpack.c.l.bf16 %v825_v36  ;;  %v830_v43 = vld [vmem:[%s1375_s0 + $0x30] sm:$0xff]   ;;  %v656_v44 = vunpack.c.h.bf16 %v825_v36  ;;  %v659_v46 = vunpack.c.l.bf16 %v826_v42  ;;  %v831_v49 = vld [vmem:[%s1375_s0 + $0x38] sm:$0xff]   ;;  %v660_v50 = vunpack.c.h.bf16 %v826_v42 }
   0x9   :  { %955 = vmatpush3.bf16.msra.mxu0 %v832_v7  ;;  %989 = vmatpush3.bf16.msra.mxu1 %v832_v7  ;;  %v671_v41 = vunpack.c.l.bf16 %v829_v37  ;;  %v672_v45 = vunpack.c.h.bf16 %v829_v37  ;;  %v675_v47 = vunpack.c.l.bf16 %v830_v43  ;;  %v676_v51 = vunpack.c.h.bf16 %v830_v43 }
   0xa   :  { %957 = vmatprep.subr.bf16.mxu0 %v833_v15  ;;  %982 = vmatprep.subr.bf16.mxu1 %v833_v15  ;;  %v663_v52 = vunpack.c.l.bf16 %v827_v48  ;;  %v679_v53 = vunpack.c.l.bf16 %v831_v49  ;;  %v664_v54 = vunpack.c.h.bf16 %v827_v48  ;;  %v680_v55 = vunpack.c.h.bf16 %v831_v49 }
   0xc   :  { %345 = vmax.xlane.f32.xlu0 %v763_v13  ;;  %347 = vmax.xlane.f32.xlu1 %v764_v14 }
   0xd   :  { %959 = vmatpush3.bf16.msra.mxu0 %v833_v15  ;;  %990 = vmatpush3.bf16.msra.mxu1 %v833_v15 }
   0xe   :  { %961 = vmatprep.subr.bf16.mxu0 %v834_v19  ;;  %983 = vmatprep.subr.bf16.mxu1 %v834_v19 }
  0x10   :  { %349 = vmax.xlane.f32.xlu0 %v767_v17  ;;  %351 = vmax.xlane.f32.xlu1 %v768_v18 }
  0x11   :  { %963 = vmatpush3.bf16.msra.mxu0 %v834_v19  ;;  %991 = vmatpush3.bf16.msra.mxu1 %v834_v19 }
  0x12   :  { %965 = vmatprep.subr.bf16.mxu0 %v835_v23  ;;  %984 = vmatprep.subr.bf16.mxu1 %v835_v23 }
  0x14   :  { %353 = vmax.xlane.f32.xlu0 %v771_v21  ;;  %355 = vmax.xlane.f32.xlu1 %v772_v22 }
  0x15   :  { %967 = vmatpush3.bf16.msra.mxu0 %v835_v23  ;;  %992 = vmatpush3.bf16.msra.mxu1 %v835_v23 }
  0x16   :  { %969 = vmatprep.subr.bf16.mxu0 %v836_v27  ;;  %985 = vmatprep.subr.bf16.mxu1 %v836_v27 }
  0x18   :  { %357 = vmax.xlane.f32.xlu0 %v775_v25  ;;  %359 = vmax.xlane.f32.xlu1 %v776_v26 }
  0x19   :  { %971 = vmatpush3.bf16.msra.mxu0 %v836_v27  ;;  %993 = vmatpush3.bf16.msra.mxu1 %v836_v27 }
  0x1a   :  { %973 = vmatprep.subr.bf16.mxu0 %v837_v31  ;;  %986 = vmatprep.subr.bf16.mxu1 %v837_v31 }
  0x1c   :  { %361 = vmax.xlane.f32.xlu0 %v779_v29  ;;  %363 = vmax.xlane.f32.xlu1 %v780_v30 }
  0x1d   :  { %975 = vmatpush3.bf16.msra.mxu0 %v837_v31  ;;  %994 = vmatpush3.bf16.msra.mxu1 %v837_v31 }
  0x1e   :  { %977 = vmatprep.subr.bf16.mxu0 %v838_v35  ;;  %987 = vmatprep.subr.bf16.mxu1 %v838_v35 }
  0x20   :  { %365 = vmax.xlane.f32.xlu0 %v783_v33  ;;  %367 = vmax.xlane.f32.xlu1 %v784_v34 }
  0x21   :  { %979 = vmatpush3.bf16.msra.mxu0 %v838_v35  ;;  %995 = vmatpush3.bf16.msra.mxu1 %v838_v35 }
  0x24   :  { %925 = vmatmul.mubr.f32.vlgmr.msra.gmra.mrb[0].mxu0 %v652_v38  ;;  %937 = vmatmul.mubr.f32.vlgmr.msra.gmra.mrb[0].mxu1 %v668_v39 }
  0x25   :  { %927 = vmatprep.mubr.f32.mxu0 %v655_v40  ;;  %939 = vmatprep.mubr.f32.mxu1 %v671_v41 }
  0x28   :  { %928 = vmatmul.mubr.f32.gmra.mrb[2].mxu0 %v656_v44  ;;  %940 = vmatmul.mubr.f32.gmra.mrb[2].mxu1 %v672_v45 }
  0x29   :  { %930 = vmatprep.mubr.f32.mxu0 %v659_v46  ;;  %942 = vmatprep.mubr.f32.mxu1 %v675_v47 }
  0x2c   :  { %931 = vmatmul.mubr.f32.gmra.mrb[4].mxu0 %v660_v50  ;;  %943 = vmatmul.mubr.f32.gmra.mrb[4].mxu1 %v676_v51 }
  0x2d   :  { %933 = vmatprep.mubr.f32.mxu0 %v663_v52  ;;  %945 = vmatprep.mubr.f32.mxu1 %v679_v53 }
  0x30   :  { %934 = vmatmul.mubr.f32.gmra.mrb[6].mxu0 %v664_v54  ;;  %946 = vmatmul.mubr.f32.gmra.mrb[6].mxu1 %v680_v55 }
  0x91   :  { %v338_v56 = vpop.xlane.xlu0 %337  ;;  %v342_v57 = vpop.xlane.xlu1 %341 }
  0x92   :  { %v369_v58 = vsub.f32 %v755_v2, %v338_v56  ;;  %v371_v59 = vsub.f32 %v759_v3, %v342_v57 }
  0x94   :  { %v385_v60 = vmul.f32 1.442695, %v369_v58  ;;  %v389_v61 = vmul.f32 1.442695, %v371_v59 }
  0x95   :  { %v340_v62 = vpop.xlane.xlu0 %339  ;;  %v344_v63 = vpop.xlane.xlu1 %343 }
  0x96   :  { %996 = vpow2.f32 %v385_v60  ;;  %v370_v4 = vsub.f32 %v756_v5, %v340_v62  ;;  %v372_v7 = vsub.f32 %v760_v6, %v344_v63 }
  0x97   :  { %998 = vpow2.f32 %v389_v61 }
  0x98   :  { %v387_v9 = vmul.f32 1.442695, %v370_v4  ;;  %v391_v10 = vmul.f32 1.442695, %v372_v7 }
  0x99   :  { %v346_v11 = vpop.xlane.xlu0 %345  ;;  %v348_v12 = vpop.xlane.xlu1 %347 }
  0x9a   :  { %1000 = vpow2.f32 %v387_v9  ;;  %v373_v2 = vsub.f32 %v763_v13, %v346_v11  ;;  %v374_v3 = vsub.f32 %v764_v14, %v348_v12 }
  0x9b   :  { %1002 = vpow2.f32 %v391_v10 }
  0x9c   :  { %v393_v15 = vmul.f32 1.442695, %v373_v2  ;;  %v395_v19 = vmul.f32 1.442695, %v374_v3 }
  0x9d   :  { %v350_v0 = vpop.xlane.xlu0 %349  ;;  %v352_v5 = vpop.xlane.xlu1 %351 }
  0x9e   :  { %1004 = vpow2.f32 %v393_v15  ;;  %v375_v1 = vsub.f32 %v767_v17, %v350_v0  ;;  %v376_v6 = vsub.f32 %v768_v18, %v352_v5 }
  0x9f   :  { %1006 = vpow2.f32 %v395_v19 }
  0xa0   :  { %v1245_v23 = vpop.eup %996  ;;  %v397_v27 = vmul.f32 1.442695, %v375_v1  ;;  %v399_v13 = vmul.f32 1.442695, %v376_v6 }
  0xa1   :  { %417 = vadd.xlane.f32.xlu0 %v1245_v23  ;;  %v354_v8 = vpop.xlane.xlu0 %353  ;;  %v356_v14 = vpop.xlane.xlu1 %355 }
  0xa2   :  { %v1248_v31 = vpop.eup %998  ;;  %1008 = vpow2.f32 %v397_v27  ;;  %v377_v35 = vsub.f32 %v771_v21, %v354_v8  ;;  %v378_v17 = vsub.f32 %v772_v22, %v356_v14 }
  0xa3   :  { %1010 = vpow2.f32 %v399_v13 }
  0xa4   :  { %v1254_v16 = vpop.eup %1000  ;;  %v401_v18 = vmul.f32 1.442695, %v377_v35  ;;  %v403_v36 = vmul.f32 1.442695, %v378_v17 }
  0xa5   :  { %421 = vadd.xlane.f32.xlu0 %v1248_v31  ;;  %419 = vadd.xlane.f32.xlu1 %v1254_v16  ;;  %v358_v37 = vpop.xlane.xlu0 %357  ;;  %v360_v38 = vpop.xlane.xlu1 %359 }
  0xa6   :  { %v1258_v39 = vpop.eup %1002  ;;  %1012 = vpow2.f32 %v401_v18  ;;  %v379_v21 = vsub.f32 %v775_v25, %v358_v37  ;;  %v380_v20 = vsub.f32 %v776_v26, %v360_v38 }
  0xa7   :  { %1014 = vpow2.f32 %v403_v36 }
  0xa8   :  { %v1264_v22 = vpop.eup %1004  ;;  %v405_v40 = vmul.f32 1.442695, %v379_v21  ;;  %v407_v41 = vmul.f32 1.442695, %v380_v20 }
  0xa9   :  { %423 = vadd.xlane.f32.xlu1 %v1258_v39  ;;  %425 = vadd.xlane.f32.xlu0 %v1264_v22  ;;  %v362_v42 = vpop.xlane.xlu0 %361  ;;  %v364_v43 = vpop.xlane.xlu1 %363 }
  0xaa   :  { %v1268_v44 = vpop.eup %1006  ;;  %1016 = vpow2.f32 %v405_v40  ;;  %v381_v25 = vsub.f32 %v779_v29, %v362_v42  ;;  %v382_v24 = vsub.f32 %v780_v30, %v364_v43 }
  0xab   :  { %1018 = vpow2.f32 %v407_v41 }
  0xac   :  { %v1274_v26 = vpop.eup %1008  ;;  %v409_v45 = vmul.f32 1.442695, %v381_v25  ;;  %v411_v46 = vmul.f32 1.442695, %v382_v24 }
  0xad   :  { %427 = vadd.xlane.f32.xlu1 %v1268_v44  ;;  %429 = vadd.xlane.f32.xlu0 %v1274_v26  ;;  %v366_v47 = vpop.xlane.xlu0 %365  ;;  %v368_v48 = vpop.xlane.xlu1 %367 }
  0xae   :  { %v1278_v49 = vpop.eup %1010  ;;  %1020 = vpow2.f32 %v409_v45  ;;  %v383_v29 = vsub.f32 %v783_v33, %v366_v47  ;;  %v384_v28 = vsub.f32 %v784_v34, %v368_v48 }
  0xaf   :  { %1022 = vpow2.f32 %v411_v46 }
  0xb0   :  { %v1284_v30 = vpop.eup %1012  ;;  %v413_v50 = vmul.f32 1.442695, %v383_v29  ;;  %v415_v51 = vmul.f32 1.442695, %v384_v28 }
  0xb1   :  { %431 = vadd.xlane.f32.xlu1 %v1278_v49  ;;  %433 = vadd.xlane.f32.xlu0 %v1284_v30  ;;  %v1288_v52 = vpop.eup %1014 }
  0xb2   :  { %1024 = vpow2.f32 %v413_v50 }
  0xb3   :  { %1026 = vpow2.f32 %v415_v51 }
  0xb4   :  { %v1290_v53 = vpop.eup %1016 }
  0xb5   :  { %435 = vadd.xlane.f32.xlu1 %v1288_v52  ;;  %437 = vadd.xlane.f32.xlu0 %v1290_v53  ;;  %v1294_v32 = vpop.eup %1018 }
  0xb8   :  { %v1296_v33 = vpop.eup %1020 }
  0xb9   :  { %439 = vadd.xlane.f32.xlu1 %v1294_v32  ;;  %441 = vadd.xlane.f32.xlu0 %v1296_v33  ;;  %v1300_v34 = vpop.eup %1022 }
  0xbc   :  { %v1302_v54 = vpop.eup %1024 }
  0xbd   :  { %443 = vadd.xlane.f32.xlu1 %v1300_v34  ;;  %445 = vadd.xlane.f32.xlu0 %v1302_v54  ;;  %v1306_v55 = vpop.eup %1026 }
  0xc1   :  { %447 = vadd.xlane.f32.xlu1 %v1306_v55 }
  0xf7   :  { %v926_v56 = vpop.f32.mrb[0].mxu0  ;;  %v938_v57 = vpop.f32.mrb[0].mxu1 }
  0xf8   :  { %v146_v58 = vpop.f32.mrb[1].mxu0  ;;  %v186_v59 = vpop.f32.mrb[1].mxu1 }
  0xf9   :  { %v716_v60 = vpack.c.bf16 %v926_v56, %v146_v58  ;;  %v736_v61 = vpack.c.bf16 %v938_v57, %v186_v59 }
  0xfb   :  { %717 = vst [vmem:[%s1376_s3] sm:$0xff] %v716_v60   ;;  %842 = vst [vmem:[%s1376_s3 + $0x20] sm:$0xff] %v736_v61   ;;  %v929_v62 = vpop.f32.mrb[2].mxu0  ;;  %v941_v63 = vpop.f32.mrb[2].mxu1 }
  0xfc   :  { %v156_v4 = vpop.f32.mrb[3].mxu0  ;;  %v196_v7 = vpop.f32.mrb[3].mxu1 }
  0xfd   :  { %v721_v9 = vpack.c.bf16 %v929_v62, %v156_v4  ;;  %v741_v10 = vpack.c.bf16 %v941_v63, %v196_v7 }
  0xff   :  { %839 = vst [vmem:[%s1376_s3 + $0x8] sm:$0xff] %v721_v9   ;;  %843 = vst [vmem:[%s1376_s3 + $0x28] sm:$0xff] %v741_v10   ;;  %v932_v11 = vpop.f32.mrb[4].mxu0  ;;  %v944_v12 = vpop.f32.mrb[4].mxu1 }
 0x100   :  { %v166_v2 = vpop.f32.mrb[5].mxu0  ;;  %v206_v3 = vpop.f32.mrb[5].mxu1 }
 0x101   :  { %v726_v15 = vpack.c.bf16 %v932_v11, %v166_v2  ;;  %v746_v19 = vpack.c.bf16 %v944_v12, %v206_v3 }
 0x103   :  { %840 = vst [vmem:[%s1376_s3 + $0x10] sm:$0xff] %v726_v15   ;;  %844 = vst [vmem:[%s1376_s3 + $0x30] sm:$0xff] %v746_v19   ;;  %v935_v0 = vpop.f32.mrb[6].mxu0  ;;  %v947_v5 = vpop.f32.mrb[6].mxu1 }
 0x104   :  { %v176_v1 = vpop.f32.mrb[7].mxu0  ;;  %v216_v6 = vpop.f32.mrb[7].mxu1 }
 0x105   :  { %v731_v27 = vpack.c.bf16 %v935_v0, %v176_v1  ;;  %v751_v13 = vpack.c.bf16 %v947_v5, %v216_v6 }
 0x107   :  { %841 = vst [vmem:[%s1376_s3 + $0x18] sm:$0xff] %v731_v27   ;;  %845 = vst [vmem:[%s1376_s3 + $0x38] sm:$0xff] %v751_v13  }
 0x12e   :  { %v418_v8 = vpop.xlane.xlu0 %417 }
 0x12f   :  { %1028 = vrcp.f32 %v418_v8 }
 0x132   :  { %v420_v14 = vpop.xlane.xlu1 %419  ;;  %v422_v35 = vpop.xlane.xlu0 %421 }
 0x133   :  { %1030 = vrcp.f32 %v420_v14 }
 0x134   :  { %1032 = vrcp.f32 %v422_v35 }
 0x136   :  { %v424_v17 = vpop.xlane.xlu1 %423  ;;  %v426_v18 = vpop.xlane.xlu0 %425 }
 0x137   :  { %1034 = vrcp.f32 %v424_v17 }
 0x138   :  { %1036 = vrcp.f32 %v426_v18 }
 0x139   :  { %v1029_v38 = vpop.eup %1028 }
 0x13a   :  { %v428_v36 = vpop.xlane.xlu1 %427  ;;  %v430_v37 = vpop.xlane.xlu0 %429  ;;  %v481_v20 = vmul.f32 %v1029_v38, %v1245_v23 }
 0x13b   :  { %1038 = vrcp.f32 %v428_v36 }
 0x13c   :  { %1040 = vrcp.f32 %v430_v37 }
 0x13d   :  { %v1031_v21 = vpop.eup %1030 }
 0x13e   :  { %v482_v40 = vmul.f32 %v1031_v21, %v1254_v16  ;;  %v432_v41 = vpop.xlane.xlu1 %431  ;;  %v434_v42 = vpop.xlane.xlu0 %433 }
 0x13f   :  { %v1033_v43 = vpop.eup %1032  ;;  %1042 = vrcp.f32 %v432_v41 }
 0x140   :  { %v788_v25 = vpack.c.bf16 %v482_v40, %v481_v20  ;;  %1044 = vrcp.f32 %v434_v42  ;;  %v483_v45 = vmul.f32 %v1033_v43, %v1248_v31 }
 0x141   :  { %v1035_v24 = vpop.eup %1034 }
 0x142   :  { %789 = vst [vmem:[%s1377_s4] sm:$0xff] %v788_v25   ;;  %v484_v46 = vmul.f32 %v1035_v24, %v1258_v39  ;;  %v436_v47 = vpop.xlane.xlu1 %435  ;;  %v438_v48 = vpop.xlane.xlu0 %437 }
 0x143   :  { %v1037_v23 = vpop.eup %1036  ;;  %1046 = vrcp.f32 %v436_v47 }
 0x144   :  { %v793_v16 = vpack.c.bf16 %v484_v46, %v483_v45  ;;  %1048 = vrcp.f32 %v438_v48  ;;  %v485_v28 = vmul.f32 %v1037_v23, %v1264_v22 }
 0x145   :  { %v1039_v29 = vpop.eup %1038 }
 0x146   :  { %853 = vst [vmem:[%s1377_s4 + $0x8] sm:$0xff] %v793_v16   ;;  %v486_v50 = vmul.f32 %v1039_v29, %v1268_v44  ;;  %v440_v51 = vpop.xlane.xlu1 %439  ;;  %v442_v56 = vpop.xlane.xlu0 %441 }
 0x147   :  { %v1041_v31 = vpop.eup %1040  ;;  %1050 = vrcp.f32 %v440_v51 }
 0x148   :  { %v798_v39 = vpack.c.bf16 %v486_v50, %v485_v28  ;;  %1052 = vrcp.f32 %v442_v56  ;;  %v487_v58 = vmul.f32 %v1041_v31, %v1274_v26 }
 0x149   :  { %v1043_v57 = vpop.eup %1042 }
 0x14a   :  { %854 = vst [vmem:[%s1377_s4 + $0x10] sm:$0xff] %v798_v39   ;;  %v488_v59 = vmul.f32 %v1043_v57, %v1278_v49  ;;  %v444_v60 = vpop.xlane.xlu1 %443  ;;  %v446_v61 = vpop.xlane.xlu0 %445 }
 0x14b   :  { %v1045_v22 = vpop.eup %1044  ;;  %1054 = vrcp.f32 %v444_v60 }
 0x14c   :  { %v803_v44 = vpack.c.bf16 %v488_v59, %v487_v58  ;;  %1056 = vrcp.f32 %v446_v61  ;;  %v489_v63 = vmul.f32 %v1045_v22, %v1284_v30 }
 0x14d   :  { %v1047_v62 = vpop.eup %1046 }
 0x14e   :  { %855 = vst [vmem:[%s1377_s4 + $0x18] sm:$0xff] %v803_v44   ;;  %v490_v4 = vmul.f32 %v1047_v62, %v1288_v52  ;;  %v448_v7 = vpop.xlane.xlu1 %447  ;;  %v1049_v9 = vpop.eup %1048 }
 0x14f   :  { %1058 = vrcp.f32 %v448_v7  ;;  %v491_v10 = vmul.f32 %v1049_v9, %v1290_v53 }
 0x150   :  { %v808_v26 = vpack.c.bf16 %v490_v4, %v489_v63 }
 0x151   :  { %v1051_v49 = vpop.eup %1050 }
 0x152   :  { %856 = vst [vmem:[%s1377_s4 + $0x20] sm:$0xff] %v808_v26   ;;  %v492_v11 = vmul.f32 %v1051_v49, %v1294_v32  ;;  %v1053_v12 = vpop.eup %1052 }
 0x153   :  { %v493_v30 = vmul.f32 %v1053_v12, %v1296_v33 }
 0x154   :  { %v813_v2 = vpack.c.bf16 %v492_v11, %v491_v10 }
 0x155   :  { %v1055_v3 = vpop.eup %1054 }
 0x156   :  { %857 = vst [vmem:[%s1377_s4 + $0x28] sm:$0xff] %v813_v2   ;;  %v494_v52 = vmul.f32 %v1055_v3, %v1300_v34  ;;  %v1057_v15 = vpop.eup %1056 }
 0x157   :  { %v495_v53 = vmul.f32 %v1057_v15, %v1302_v54 }
 0x158   :  { %v818_v19 = vpack.c.bf16 %v494_v52, %v493_v30 }
 0x159   :  { %v1059_v0 = vpop.eup %1058 }
 0x15a   :  { %858 = vst [vmem:[%s1377_s4 + $0x30] sm:$0xff] %v818_v19   ;;  %v496_v32 = vmul.f32 %v1059_v0, %v1306_v55 }
 0x15c   :  { %v823_v5 = vpack.c.bf16 %v496_v32, %v495_v53 }
 0x15e   :  { %859 = vst [vmem:[%s1377_s4 + $0x38] sm:$0xff] %v823_v5  }

// kernel: hgat_forward.5
= control target key start
LH: loop header
LB: loop body
LE: loop exit
PB: predicated region body
PF: predicated region fallthrough
CT: control target
= control target key end

     0   :  { %v133_v5 = vlaneseq  ;;  %s1499_s0 = inlined_call_operand.vmem [shape: bf16[128,128], index: 0, kind: input, shape index: {}]   ;;  %s1500_s1 = inlined_call_operand.vmem [shape: f32[1,128], index: 1, kind: input, shape index: {}]   ;;  %s1501_s2 = inlined_call_operand.vmem [shape: f32[1,128], index: 2, kind: input, shape index: {}]   ;;  %s1502_s3 = inlined_call_operand.vmem [shape: bf16[128,128], index: 3, kind: input, shape index: {}]   ;;  %s1503_s4 = inlined_call_operand.vmem [shape: bf16[128,128], index: 4, kind: input, shape index: {}]   ;;  %s1504_s6 = inlined_call_operand.vmem [shape: bf16[128,128], index: 6, kind: output, shape index: {1}]   ;;  %s1505_s5 = inlined_call_operand.vmem [shape: bf16[128,128], index: 5, kind: output, shape index: {0}]  }
   0x1   :  { %v841_v0 = vld [vmem:[%s1499_s0] sm:$0xff]   ;;  %v976_v6 = vld [vmem:[%s1499_s0 + $0x8] sm:$0xff]   ;;  %v977_v7 = vld [vmem:[%s1499_s0 + $0x10] sm:$0xff]  }
   0x2   :  { %v74_v1 = vld [vmem:[%s1501_s2] sm:$0x1]  ;;  %v842_v3 = vunpack.c.l.bf16 %v841_v0  ;;  %v843_v4 = vunpack.c.h.bf16 %v841_v0  ;;  %v978_v8 = vld [vmem:[%s1499_s0 + $0x18] sm:$0xff]   ;;  %v846_v9 = vunpack.c.l.bf16 %v976_v6  ;;  %v847_v10 = vunpack.c.h.bf16 %v976_v6  ;;  %v983_v18 = vld [vmem:[%s1502_s3 + $0x8] sm:$0xff]  }
   0x3   :  { %v1322_v2 = vld [vmem:[%s1500_s1] ss:$0 sm:$0xff]  ;;  %1244 = vrcp.f32 %v74_v1  ;;  %v850_v11 = vunpack.c.l.bf16 %v977_v7  ;;  %v851_v12 = vunpack.c.h.bf16 %v977_v7  ;;  %v854_v15 = vunpack.c.l.bf16 %v978_v8  ;;  %v980_v31 = vld [vmem:[%s1499_s0 + $0x28] sm:$0xff]   ;;  %v984_v34 = vld [vmem:[%s1502_s3 + $0x10] sm:$0xff]  }
   0x4   :  { %v84_v13 = vsub.f32 %v842_v3, %v1322_v2  ;;  %v85_v14 = vsub.f32 %v843_v4, %v1322_v2  ;;  %v979_v16 = vld [vmem:[%s1499_s0 + $0x20] sm:$0xff]   ;;  %v86_v19 = vsub.f32 %v846_v9, %v1322_v2  ;;  %v87_v20 = vsub.f32 %v847_v10, %v1322_v2  ;;  %v981_v41 = vld [vmem:[%s1499_s0 + $0x30] sm:$0xff]   ;;  %v985_v46 = vld [vmem:[%s1502_s3 + $0x18] sm:$0xff]  }
   0x5   :  { %v873_v17 = vld [vmem:[%s1502_s3] sm:$0xff]   ;;  %v88_v21 = vsub.f32 %v850_v11, %v1322_v2  ;;  %v89_v22 = vsub.f32 %v851_v12, %v1322_v2  ;;  %v855_v25 = vunpack.c.h.bf16 %v978_v8  ;;  %v90_v26 = vsub.f32 %v854_v15, %v1322_v2  ;;  %v982_v54 = vld [vmem:[%s1499_s0 + $0x38] sm:$0xff]   ;;  %v987_v4 = vld [vmem:[%s1502_s3 + $0x28] sm:$0xff]  }
   0x6   :  { %1181 = vmatprep.subr.bf16.mxu0 %v873_v17  ;;  %v100_v23 = vmul.f32 1.442695, %v84_v13  ;;  %v102_v24 = vmul.f32 1.442695, %v85_v14  ;;  %v134_v27 = vshrl.u32 %v133_v5, 7  ;;  %v858_v30 = vunpack.c.l.bf16 %v979_v16  ;;  %v986_v55 = vld [vmem:[%s1502_s3 + $0x20] sm:$0xff]  }
   0x7   :  { %1183 = vmatpush3.bf16.msra.mxu0 %v873_v17  ;;  %v104_v28 = vmul.f32 1.442695, %v86_v19  ;;  %v106_v29 = vmul.f32 1.442695, %v87_v20  ;;  %v108_v32 = vmul.f32 1.442695, %v88_v21  ;;  %v91_v33 = vsub.f32 %v855_v25, %v1322_v2 }
   0x8   :  { %1185 = vmatprep.subr.bf16.mxu0 %v983_v18  ;;  %1246 = vpow2.f32 %v100_v23  ;;  %v110_v35 = vmul.f32 1.442695, %v89_v22  ;;  %v112_v36 = vmul.f32 1.442695, %v90_v26  ;;  %v859_v37 = vunpack.c.h.bf16 %v979_v16  ;;  %v988_v19 = vld [vmem:[%s1502_s3 + $0x30] sm:$0xff]   ;;  %v989_v26 = vld [vmem:[%s1502_s3 + $0x38] sm:$0xff]  }
   0x9   :  { %1248 = vpow2.f32 %v102_v24  ;;  %v92_v38 = vsub.f32 %v858_v30, %v1322_v2  ;;  %v862_v39 = vunpack.c.l.bf16 %v980_v31  ;;  %v863_v40 = vunpack.c.h.bf16 %v980_v31 }
   0xa   :  { %1250 = vpow2.f32 %v104_v28  ;;  %v135_v42 = vsub.s32 0, %v134_v27  ;;  %v114_v43 = vmul.f32 1.442695, %v91_v33  ;;  %v93_v44 = vsub.f32 %v859_v37, %v1322_v2  ;;  %v905_v28 = vld [vmem:[%s1503_s4] sm:$0xff]  }
   0xb   :  { %1187 = vmatpush3.bf16.msra.mxu0 %v983_v18  ;;  %1252 = vpow2.f32 %v106_v29  ;;  %v866_v47 = vunpack.c.l.bf16 %v981_v41  ;;  %v116_v48 = vmul.f32 1.442695, %v92_v38  ;;  %v94_v49 = vsub.f32 %v862_v39, %v1322_v2  ;;  %v990_v29 = vld [vmem:[%s1503_s4 + $0x8] sm:$0xff]   ;;  %1213 = vmatprep.subr.bf16.mxu1 %v905_v28 }
   0xc   :  { %1189 = vmatprep.subr.bf16.mxu0 %v984_v34  ;;  %1254 = vpow2.f32 %v108_v32  ;;  %v95_v50 = vsub.f32 %v863_v40, %v1322_v2  ;;  %v118_v52 = vmul.f32 1.442695, %v93_v44  ;;  %v867_v53 = vunpack.c.h.bf16 %v981_v41  ;;  %1215 = vmatpush3.bf16.msra.mxu1 %v905_v28  ;;  %v992_v41 = vld [vmem:[%s1503_s4 + $0x18] sm:$0xff]  }
   0xd   :  { %v1245_v45 = vpop.eup %1244  ;;  %1256 = vpow2.f32 %v110_v35  ;;  %v96_v56 = vsub.f32 %v866_v47, %v1322_v2  ;;  %v120_v58 = vmul.f32 1.442695, %v94_v49  ;;  %v870_v60 = vunpack.c.l.bf16 %v982_v54  ;;  %1217 = vmatprep.subr.bf16.mxu1 %v990_v29  ;;  %v991_v35 = vld [vmem:[%s1503_s4 + $0x10] sm:$0xff]   ;;  %v993_v47 = vld [vmem:[%s1503_s4 + $0x20] sm:$0xff]  }
   0xe   :  { %1258 = vpow2.f32 %v112_v36  ;;  %v1366_v51 = vrot.slane %v1245_v45, %v135_v42  ;;  %v122_v59 = vmul.f32 1.442695, %v95_v50  ;;  %v97_v63 = vsub.f32 %v867_v53, %v1322_v2 }
   0xf   :  { %1191 = vmatpush3.bf16.msra.mxu0 %v984_v34  ;;  %1260 = vpow2.f32 %v114_v43  ;;  %v871_v0 = vunpack.c.h.bf16 %v982_v54  ;;  %v124_v7 = vmul.f32 1.442695, %v96_v56  ;;  %v98_v11 = vsub.f32 %v870_v60, %v1322_v2  ;;  %v995_v54 = vld [vmem:[%s1503_s4 + $0x30] sm:$0xff]  }
  0x10   :  { %1193 = vmatprep.subr.bf16.mxu0 %v985_v46  ;;  %1262 = vpow2.f32 %v116_v48  ;;  %v126_v13 = vmul.f32 1.442695, %v97_v63  ;;  %1219 = vmatpush3.bf16.msra.mxu1 %v990_v29 }
  0x11   :  { %1264 = vpow2.f32 %v118_v52  ;;  %v99_v14 = vsub.f32 %v871_v0, %v1322_v2  ;;  %v128_v21 = vmul.f32 1.442695, %v98_v11  ;;  %1221 = vmatprep.subr.bf16.mxu1 %v991_v35  ;;  %v994_v52 = vld [vmem:[%s1503_s4 + $0x28] sm:$0xff]  }
  0x12   :  { %v1247_v57 = vpop.eup %1246  ;;  %1266 = vpow2.f32 %v120_v58 }
  0x13   :  { %1195 = vmatpush3.bf16.msra.mxu0 %v985_v46  ;;  %v1249_v61 = vpop.eup %1248  ;;  %v138_v62 = vmul.f32 %v1247_v57, %v1366_v51  ;;  %1268 = vpow2.f32 %v122_v59  ;;  %v130_v22 = vmul.f32 1.442695, %v99_v14 }
  0x14   :  { %1197 = vmatprep.subr.bf16.mxu0 %v986_v55  ;;  %v1251_v1 = vpop.eup %1250  ;;  %v139_v3 = vmul.f32 %v1249_v61, %v1366_v51  ;;  %1270 = vpow2.f32 %v124_v7  ;;  %1223 = vmatpush3.bf16.msra.mxu1 %v991_v35 }
  0x15   :  { %v1253_v5 = vpop.eup %1252  ;;  %v140_v6 = vmul.f32 %v1251_v1, %v1366_v51  ;;  %1272 = vpow2.f32 %v126_v13  ;;  %1225 = vmatprep.subr.bf16.mxu1 %v992_v41 }
  0x16   :  { %v1255_v8 = vpop.eup %1254  ;;  %v154_v9 = vpack.c.bf16 %v139_v3, %v138_v62  ;;  %v141_v10 = vmul.f32 %v1253_v5, %v1366_v51  ;;  %1274 = vpow2.f32 %v128_v21 }
  0x17   :  { %1199 = vmatpush3.bf16.msra.mxu0 %v986_v55  ;;  %v1257_v12 = vpop.eup %1256  ;;  %v142_v17 = vmul.f32 %v1255_v8, %v1366_v51  ;;  %1276 = vpow2.f32 %v130_v22 }
  0x18   :  { %1201 = vmatprep.subr.bf16.mxu0 %v987_v4  ;;  %v1259_v15 = vpop.eup %1258  ;;  %162 = vxpose.xlu0.c.b16.start [1/8] %v154_v9, 128  ;;  %v155_v16 = vpack.c.bf16 %v141_v10, %v140_v6  ;;  %v143_v18 = vmul.f32 %v1257_v12, %v1366_v51 }
  0x19   :  { %v1261_v20 = vpop.eup %1260  ;;  %v144_v24 = vmul.f32 %v1259_v15, %v1366_v51  ;;  %1227 = vmatpush3.bf16.msra.mxu1 %v992_v41 }
  0x1a   :  { %v1263_v2 = vpop.eup %1262  ;;  %v156_v23 = vpack.c.bf16 %v143_v18, %v142_v17  ;;  %v145_v25 = vmul.f32 %v1261_v20, %v1366_v51  ;;  %1229 = vmatprep.subr.bf16.mxu1 %v993_v47 }
  0x1b   :  { %1203 = vmatpush3.bf16.msra.mxu0 %v987_v4  ;;  %v1265_v27 = vpop.eup %1264  ;;  %v146_v32 = vmul.f32 %v1263_v2, %v1366_v51 }
  0x1c   :  { %1205 = vmatprep.subr.bf16.mxu0 %v988_v19  ;;  %163 = vxpose.xlu0.c.b16.cont [2/8] %v155_v16, 128  ;;  %v1267_v30 = vpop.eup %1266  ;;  %v157_v31 = vpack.c.bf16 %v145_v25, %v144_v24  ;;  %v147_v33 = vmul.f32 %v1265_v27, %v1366_v51 }
  0x1d   :  { %v1269_v34 = vpop.eup %1268  ;;  %v148_v38 = vmul.f32 %v1267_v30, %v1366_v51  ;;  %1231 = vmatpush3.bf16.msra.mxu1 %v993_v47  ;;  %v996_v30 = vld [vmem:[%s1503_s4 + $0x38] sm:$0xff]  }
  0x1e   :  { %v1271_v36 = vpop.eup %1270  ;;  %v158_v37 = vpack.c.bf16 %v147_v33, %v146_v32  ;;  %v149_v39 = vmul.f32 %v1269_v34, %v1366_v51  ;;  %1233 = vmatprep.subr.bf16.mxu1 %v994_v52 }
  0x1f   :  { %1207 = vmatpush3.bf16.msra.mxu0 %v988_v19  ;;  %v1273_v40 = vpop.eup %1272  ;;  %v150_v44 = vmul.f32 %v1271_v36, %v1366_v51 }
  0x20   :  { %1209 = vmatprep.subr.bf16.mxu0 %v989_v26  ;;  %164 = vxpose.xlu0.c.b16.cont [3/8] %v156_v23, 128  ;;  %v1275_v42 = vpop.eup %1274  ;;  %v159_v43 = vpack.c.bf16 %v149_v39, %v148_v38  ;;  %v151_v45 = vmul.f32 %v1273_v40, %v1366_v51 }
  0x21   :  { %v1277_v46 = vpop.eup %1276  ;;  %v152_v49 = vmul.f32 %v1275_v42, %v1366_v51  ;;  %1235 = vmatpush3.bf16.msra.mxu1 %v994_v52 }
  0x22   :  { %v160_v48 = vpack.c.bf16 %v151_v45, %v150_v44  ;;  %v153_v50 = vmul.f32 %v1277_v46, %v1366_v51  ;;  %1237 = vmatprep.subr.bf16.mxu1 %v995_v54 }
  0x23   :  { %1211 = vmatpush3.bf16.msra.mxu0 %v989_v26 }
  0x24   :  { %165 = vxpose.xlu0.c.b16.cont [4/8] %v157_v31, 128  ;;  %v161_v53 = vpack.c.bf16 %v153_v50, %v152_v49 }
  0x25   :  { %1239 = vmatpush3.bf16.msra.mxu1 %v995_v54 }
  0x26   :  { %1241 = vmatprep.subr.bf16.mxu1 %v996_v30 }
  0x28   :  { %166 = vxpose.xlu0.c.b16.cont [5/8] %v158_v37, 128 }
  0x29   :  { %1243 = vmatpush3.bf16.msra.mxu1 %v996_v30 }
  0x2c   :  { %167 = vxpose.xlu0.c.b16.cont [6/8] %v159_v43, 128 }
  0x30   :  { %168 = vxpose.xlu0.c.b16.cont [7/8] %v160_v48, 128 }
  0x34   :  { %169 = vxpose.xlu0.c.b16.end [8/8] %v161_v53, 128 }
  0x7e   :  { %v170_v55 = vpop.trf.xlu0 }
  0x7f   :  { %v792_v51 = vcombine.low %v170_v55, %v170_v55  ;;  %v793_v56 = vcombine.high %v170_v55, %v170_v55  ;;  %v266_v57 = vunpack.c.l.bf16 %v170_v55  ;;  %v267_v58 = vunpack.c.h.bf16 %v170_v55 }
  0x81   :  { %234 = vst [vmem:[%s1504_s6] sm:$0xf] %v792_v51  ;;  %235 = vst [vmem:[%s1504_s6 + $0x4] sm:$0xf] %v793_v56  ;;  %1100 = vmatprep.mubr.f32.mxu0 %v266_v57 }
  0x82   :  { %v171_v59 = vpop.trf.xlu0  ;;  %1101 = vmatmul.mubr.f32.vlgmr.msra.gmra.mrb[0].mxu0 %v267_v58 }
  0x83   :  { %v794_v60 = vcombine.low %v171_v59, %v171_v59  ;;  %v795_v61 = vcombine.high %v171_v59, %v171_v59  ;;  %v268_v62 = vunpack.c.l.bf16 %v171_v59  ;;  %v269_v63 = vunpack.c.h.bf16 %v171_v59 }
  0x85   :  { %236 = vst [vmem:[%s1504_s6 + $0x8] sm:$0xf] %v794_v60  ;;  %237 = vst [vmem:[%s1504_s6 + $0xc] sm:$0xf] %v795_v61  ;;  %1103 = vmatprep.mubr.f32.mxu0 %v268_v62 }
  0x86   :  { %v172_v0 = vpop.trf.xlu0  ;;  %1104 = vmatmul.mubr.f32.gmra.mrb[2].mxu0 %v269_v63 }
  0x87   :  { %v796_v1 = vcombine.low %v172_v0, %v172_v0  ;;  %v797_v3 = vcombine.high %v172_v0, %v172_v0  ;;  %v270_v4 = vunpack.c.l.bf16 %v172_v0  ;;  %v271_v5 = vunpack.c.h.bf16 %v172_v0 }
  0x89   :  { %238 = vst [vmem:[%s1504_s6 + $0x10] sm:$0xf] %v796_v1  ;;  %239 = vst [vmem:[%s1504_s6 + $0x14] sm:$0xf] %v797_v3  ;;  %1106 = vmatprep.mubr.f32.mxu0 %v270_v4 }
  0x8a   :  { %v173_v6 = vpop.trf.xlu0  ;;  %1107 = vmatmul.mubr.f32.gmra.mrb[4].mxu0 %v271_v5 }
  0x8b   :  { %v798_v7 = vcombine.low %v173_v6, %v173_v6  ;;  %v799_v8 = vcombine.high %v173_v6, %v173_v6  ;;  %v272_v9 = vunpack.c.l.bf16 %v173_v6  ;;  %v273_v10 = vunpack.c.h.bf16 %v173_v6 }
  0x8d   :  { %240 = vst [vmem:[%s1504_s6 + $0x18] sm:$0xf] %v798_v7  ;;  %241 = vst [vmem:[%s1504_s6 + $0x1c] sm:$0xf] %v799_v8  ;;  %1109 = vmatprep.mubr.f32.mxu0 %v272_v9 }
  0x8e   :  { %v174_v11 = vpop.trf.xlu0  ;;  %1110 = vmatmul.mubr.f32.gmra.mrb[6].mxu0 %v273_v10 }
  0x8f   :  { %v800_v12 = vcombine.low %v174_v11, %v174_v11  ;;  %v801_v13 = vcombine.high %v174_v11, %v174_v11  ;;  %v274_v14 = vunpack.c.l.bf16 %v174_v11  ;;  %v275_v15 = vunpack.c.h.bf16 %v174_v11 }
  0x91   :  { %242 = vst [vmem:[%s1504_s6 + $0x20] sm:$0xf] %v800_v12  ;;  %243 = vst [vmem:[%s1504_s6 + $0x24] sm:$0xf] %v801_v13  ;;  %1112 = vmatprep.mubr.f32.mxu0 %v274_v14 }
  0x92   :  { %v175_v16 = vpop.trf.xlu0  ;;  %1113 = vmatmul.mubr.f32.gmra.mrb[8].mxu0 %v275_v15 }
  0x93   :  { %v802_v17 = vcombine.low %v175_v16, %v175_v16  ;;  %v803_v18 = vcombine.high %v175_v16, %v175_v16  ;;  %v276_v19 = vunpack.c.l.bf16 %v175_v16  ;;  %v277_v20 = vunpack.c.h.bf16 %v175_v16 }
  0x95   :  { %244 = vst [vmem:[%s1504_s6 + $0x28] sm:$0xf] %v802_v17  ;;  %245 = vst [vmem:[%s1504_s6 + $0x2c] sm:$0xf] %v803_v18  ;;  %1115 = vmatprep.mubr.f32.mxu0 %v276_v19 }
  0x96   :  { %v176_v21 = vpop.trf.xlu0  ;;  %1116 = vmatmul.mubr.f32.gmra.mrb[10].mxu0 %v277_v20 }
  0x97   :  { %v804_v22 = vcombine.low %v176_v21, %v176_v21  ;;  %v805_v2 = vcombine.high %v176_v21, %v176_v21  ;;  %v278_v23 = vunpack.c.l.bf16 %v176_v21  ;;  %v279_v24 = vunpack.c.h.bf16 %v176_v21 }
  0x99   :  { %246 = vst [vmem:[%s1504_s6 + $0x30] sm:$0xf] %v804_v22  ;;  %247 = vst [vmem:[%s1504_s6 + $0x34] sm:$0xf] %v805_v2  ;;  %1118 = vmatprep.mubr.f32.mxu0 %v278_v23 }
  0x9a   :  { %v177_v25 = vpop.trf.xlu0  ;;  %1119 = vmatmul.mubr.f32.gmra.mrb[12].mxu0 %v279_v24 }
  0x9b   :  { %v806_v26 = vcombine.low %v177_v25, %v177_v25  ;;  %v807_v27 = vcombine.high %v177_v25, %v177_v25  ;;  %v280_v28 = vunpack.c.l.bf16 %v177_v25  ;;  %v281_v29 = vunpack.c.h.bf16 %v177_v25 }
  0x9d   :  { %248 = vst [vmem:[%s1504_s6 + $0x38] sm:$0xf] %v806_v26  ;;  %249 = vst [vmem:[%s1504_s6 + $0x3c] sm:$0xf] %v807_v27  ;;  %1121 = vmatprep.mubr.f32.mxu0 %v280_v28 }
  0x9e   :  { %1122 = vmatmul.mubr.f32.gmra.mrb[14].mxu0 %v281_v29 }
 0x155   :  { %v1102_v31 = vpop.f32.mrb[0].mxu0 }
 0x156   :  { %v380_v32 = vpop.f32.mrb[1].mxu0  ;;  %v511_v34 = vmax.f32 %v1102_v31, 0.0 }
 0x157   :  { %v510_v33 = vmax.f32 %v380_v32, 0.0 }
 0x159   :  { %v1105_v35 = vpop.f32.mrb[2].mxu0  ;;  %1156 = vmatprep.mubr.f32.mxu1 %v510_v33 }
 0x15a   :  { %v390_v36 = vpop.f32.mrb[3].mxu0  ;;  %1157 = vmatmul.mubr.f32.vlgmr.msra.gmra.mrb[0].mxu1 %v511_v34  ;;  %v513_v38 = vmax.f32 %v1105_v35, 0.0 }
 0x15b   :  { %v512_v37 = vmax.f32 %v390_v36, 0.0 }
 0x15d   :  { %v1108_v39 = vpop.f32.mrb[4].mxu0  ;;  %1159 = vmatprep.mubr.f32.mxu1 %v512_v37 }
 0x15e   :  { %v400_v40 = vpop.f32.mrb[5].mxu0  ;;  %1160 = vmatmul.mubr.f32.gmra.mrb[2].mxu1 %v513_v38  ;;  %v515_v42 = vmax.f32 %v1108_v39, 0.0 }
 0x15f   :  { %v514_v41 = vmax.f32 %v400_v40, 0.0 }
 0x161   :  { %v1111_v43 = vpop.f32.mrb[6].mxu0  ;;  %1162 = vmatprep.mubr.f32.mxu1 %v514_v41 }
 0x162   :  { %v410_v44 = vpop.f32.mrb[7].mxu0  ;;  %1163 = vmatmul.mubr.f32.gmra.mrb[4].mxu1 %v515_v42  ;;  %v517_v46 = vmax.f32 %v1111_v43, 0.0 }
 0x163   :  { %v516_v45 = vmax.f32 %v410_v44, 0.0 }
 0x165   :  { %v1114_v47 = vpop.f32.mrb[8].mxu0  ;;  %1165 = vmatprep.mubr.f32.mxu1 %v516_v45 }
 0x166   :  { %v420_v48 = vpop.f32.mrb[9].mxu0  ;;  %1166 = vmatmul.mubr.f32.gmra.mrb[6].mxu1 %v517_v46  ;;  %v519_v50 = vmax.f32 %v1114_v47, 0.0 }
 0x167   :  { %v518_v49 = vmax.f32 %v420_v48, 0.0 }
 0x169   :  { %v1117_v52 = vpop.f32.mrb[10].mxu0  ;;  %1168 = vmatprep.mubr.f32.mxu1 %v518_v49 }
 0x16a   :  { %v430_v53 = vpop.f32.mrb[11].mxu0  ;;  %1169 = vmatmul.mubr.f32.gmra.mrb[8].mxu1 %v519_v50  ;;  %v521_v55 = vmax.f32 %v1117_v52, 0.0 }
 0x16b   :  { %v520_v54 = vmax.f32 %v430_v53, 0.0 }
 0x16d   :  { %v1120_v51 = vpop.f32.mrb[12].mxu0  ;;  %1171 = vmatprep.mubr.f32.mxu1 %v520_v54 }
 0x16e   :  { %v440_v56 = vpop.f32.mrb[13].mxu0  ;;  %1172 = vmatmul.mubr.f32.gmra.mrb[10].mxu1 %v521_v55  ;;  %v523_v58 = vmax.f32 %v1120_v51, 0.0 }
 0x16f   :  { %v522_v57 = vmax.f32 %v440_v56, 0.0 }
 0x171   :  { %v1123_v59 = vpop.f32.mrb[14].mxu0  ;;  %1174 = vmatprep.mubr.f32.mxu1 %v522_v57 }
 0x172   :  { %v450_v60 = vpop.f32.mrb[15].mxu0  ;;  %1175 = vmatmul.mubr.f32.gmra.mrb[12].mxu1 %v523_v58  ;;  %v525_v62 = vmax.f32 %v1123_v59, 0.0 }
 0x173   :  { %v524_v61 = vmax.f32 %v450_v60, 0.0 }
 0x175   :  { %1177 = vmatprep.mubr.f32.mxu1 %v524_v61 }
 0x176   :  { %1178 = vmatmul.mubr.f32.gmra.mrb[14].mxu1 %v525_v62 }
 0x22d   :  { %v1158_v63 = vpop.f32.mrb[0].mxu1 }
 0x22e   :  { %v624_v0 = vpop.f32.mrb[1].mxu1 }
 0x22f   :  { %v939_v1 = vpack.c.bf16 %v1158_v63, %v624_v0 }
 0x231   :  { %940 = vst [vmem:[%s1505_s5] sm:$0xff] %v939_v1   ;;  %v1161_v3 = vpop.f32.mrb[2].mxu1 }
 0x232   :  { %v634_v4 = vpop.f32.mrb[3].mxu1 }
 0x233   :  { %v944_v5 = vpack.c.bf16 %v1161_v3, %v634_v4 }
 0x235   :  { %997 = vst [vmem:[%s1505_s5 + $0x8] sm:$0xff] %v944_v5   ;;  %v1164_v6 = vpop.f32.mrb[4].mxu1 }
 0x236   :  { %v644_v7 = vpop.f32.mrb[5].mxu1 }
 0x237   :  { %v949_v8 = vpack.c.bf16 %v1164_v6, %v644_v7 }
 0x239   :  { %998 = vst [vmem:[%s1505_s5 + $0x10] sm:$0xff] %v949_v8   ;;  %v1167_v9 = vpop.f32.mrb[6].mxu1 }
 0x23a   :  { %v654_v10 = vpop.f32.mrb[7].mxu1 }
 0x23b   :  { %v954_v11 = vpack.c.bf16 %v1167_v9, %v654_v10 }
 0x23d   :  { %999 = vst [vmem:[%s1505_s5 + $0x18] sm:$0xff] %v954_v11   ;;  %v1170_v12 = vpop.f32.mrb[8].mxu1 }
 0x23e   :  { %v664_v13 = vpop.f32.mrb[9].mxu1 }
 0x23f   :  { %v959_v14 = vpack.c.bf16 %v1170_v12, %v664_v13 }
 0x241   :  { %1000 = vst [vmem:[%s1505_s5 + $0x20] sm:$0xff] %v959_v14   ;;  %v1173_v15 = vpop.f32.mrb[10].mxu1 }
 0x242   :  { %v674_v16 = vpop.f32.mrb[11].mxu1 }
 0x243   :  { %v964_v17 = vpack.c.bf16 %v1173_v15, %v674_v16 }
 0x245   :  { %1001 = vst [vmem:[%s1505_s5 + $0x28] sm:$0xff] %v964_v17   ;;  %v1176_v18 = vpop.f32.mrb[12].mxu1 }
 0x246   :  { %v684_v19 = vpop.f32.mrb[13].mxu1 }
 0x247   :  { %v969_v20 = vpack.c.bf16 %v1176_v18, %v684_v19 }
 0x249   :  { %1002 = vst [vmem:[%s1505_s5 + $0x30] sm:$0xff] %v969_v20   ;;  %v1179_v21 = vpop.f32.mrb[14].mxu1 }
 0x24a   :  { %v694_v22 = vpop.f32.mrb[15].mxu1 }
 0x24b   :  { %v974_v2 = vpack.c.bf16 %v1179_v21, %v694_v22 }
 0x24d   :  { %1003 = vst [vmem:[%s1505_s5 + $0x38] sm:$0xff] %v974_v2  }

</bundles_post_ra>
